<compile_context>
chip_gen: v7x
topology: tpu7x:2x2x1
jax: 0.10.0
libtpu: 0.0.40
codegen_flags: <defaults>
</compile_context>

<pallas_src>
import math
from functools import partial

import numpy as np
import jax
import jax.numpy as jnp
from jax import lax
from jax.experimental import pallas as pl
from jax.experimental.pallas import tpu as pltpu


# ----------------------------------------------------------------------------- kernel
def _stack_lstm_kernel(x_ref, h0_ref, c0_ref, wih0_ref, whh0_ref, b0_ref,
                       w1_ref, b1_ref, out_ref, hn_ref, cn_ref,
                       gx_scr, c_scr, hcat_scr, *, t_true, tc):
    """Fused 2-layer LSTM recurrence over one time chunk; state carried in VMEM scratch.

    Zero-padding invariant (do not change): the H..Hp feature lanes and B..Bp batch
    rows of weights, biases, x, h0 and c0 are zero-padded.  Padded c lanes then
    evolve as c <- sigmoid(0)*c + sigmoid(0)*tanh(0) = 0.5*c and stay exactly 0,
    and the zero rows of W_hh keep padded h lanes from ever leaking into real gate
    columns.
    """
    Bp = c_scr.shape[1]
    Hp = c_scr.shape[2]

    @pl.when(pl.program_id(0) == 0)
    def _init():
        c_scr[...] = c0_ref[...]
        hcat_scr[:, 0:Hp] = h0_ref[0].astype(jnp.bfloat16)
        hcat_scr[:, Hp:2 * Hp] = h0_ref[1].astype(jnp.bfloat16)

    # Hoisted out of the serial loop: weight loads, bias broadcast, and the whole
    # layer-0 input projection (one chunk-wide MXU GEMM with the bias folded in).
    whh0 = whh0_ref[...]                                     # (Hp,   4*Hp) bf16
    w1 = w1_ref[...]                                         # (2*Hp, 4*Hp) bf16
    b1b = jnp.broadcast_to(b1_ref[...], (Bp, 4 * Hp))        # f32
    x_bf = x_ref[...].astype(jnp.bfloat16)                   # (Tc*Bp, D)
    gx_scr[...] = jnp.dot(x_bf, wih0_ref[...],
                          preferred_element_type=jnp.float32) + b0_ref[...]

    def gate_update(g, c):
        # Gate column order [i, f, o, g]: one wide sigmoid + one tanh per layer.
        sig = jax.nn.sigmoid(g[:, 0:3 * Hp])
        i = sig[:, 0 * Hp:1 * Hp]
        f = sig[:, 1 * Hp:2 * Hp]
        o = sig[:, 2 * Hp:3 * Hp]
        gg = jnp.tanh(g[:, 3 * Hp:4 * Hp])
        c_new = f * c + i * gg
        h_new = o * jnp.tanh(c_new)
        return h_new, c_new

    chunk_t0 = pl.program_id(0) * tc

    def step(t, carry):
        c0, c1 = carry
        row = pl.multiple_of(t * Bp, Bp)
        # Layer 0: recurrent matmul only (input projection precomputed in gx_scr).
        g0 = jnp.dot(hcat_scr[:, 0:Hp], whh0,
                     preferred_element_type=jnp.float32) + gx_scr[pl.ds(row, Bp), :]
        h0, c0 = gate_update(g0, c0)
        hcat_scr[:, 0:Hp] = h0.astype(jnp.bfloat16)
        # Layer 1 (eval mode: no inter-layer dropout): fused [h0 | h1_prev] matmul.
        g1 = jnp.dot(hcat_scr[...], w1, preferred_element_type=jnp.float32) + b1b
        h1, c1 = gate_update(g1, c1)
        hcat_scr[:, Hp:2 * Hp] = h1.astype(jnp.bfloat16)
        out_ref[pl.ds(row, Bp), :] = h1                      # lane-dense (Bp, Hp) store

        # Capture h_n / c_n at the true last timestep; padded tail steps keep
        # evolving throw-away state that is never read.
        @pl.when(chunk_t0 + t == t_true - 1)
        def _capture():
            hn_ref[0] = h0
            hn_ref[1] = h1
            cn_ref[0] = c0
            cn_ref[1] = c1

        return (c0, c1)

    unroll = True if tc <= 16 else next(u for u in (8, 4, 2, 1) if tc % u == 0)
    c0f, c1f = lax.fori_loop(0, tc, step, (c_scr[0], c_scr[1]), unroll=unroll)
    c_scr[0] = c0f
    c_scr[1] = c1f


# ----------------------------------------------------------------------------- wrapper
def _round_up(x, m):
    return ((x + m - 1) // m) * m


@partial(jax.jit, static_argnames=("time_chunk",))
def lstm_forward(x, h0, c0, wih0, whh0, b0, w1, b1, *, time_chunk=128):
    """2-layer LSTM forward.  x: (T,B,D) f32; h0/c0: (2,B,H) f32; weights already in
    kernel layout (gate-reordered / lane-padded columns, bf16 MXU operands)."""
    T, B, D = x.shape
    H = h0.shape[2]
    Hp = _round_up(H, 128)
    Bp = _round_up(B, 8)                      # f32 sublane tile
    Tc = max(1, min(time_chunk, T))
    T_pad = _round_up(T, Tc)                  # pad + mask tail instead of divisor search
    n_chunks = T_pad // Tc

    # x stays f32 and un-padded in D (bf16 cast happens in-kernel); only pad batch to
    # the sublane tile and time to a chunk multiple, then flatten (t, b) so the kernel
    # sees 2-D lane/sublane-aligned blocks.
    x_p = jnp.pad(x, ((0, T_pad - T), (0, Bp - B), (0, 0))).reshape(T_pad * Bp, D)
    h0_p = jnp.pad(h0, ((0, 0), (0, Bp - B), (0, Hp - H)))
    c0_p = jnp.pad(c0, ((0, 0), (0, Bp - B), (0, Hp - H)))

    # VMEM budget (grid-invariant inputs are not re-DMAed but are double-buffered).
    w_bytes = 2 * (D * 4 * Hp + Hp * 4 * Hp + 2 * Hp * 4 * Hp) * 2
    io_bytes = 2 * (Tc * Bp * D * 4 + Tc * Bp * Hp * 4)
    state_bytes = 2 * (2 * 2 * Bp * Hp * 4) * 2 + 2 * (2 * 4 * Hp * 4)
    scr_bytes = Tc * Bp * 4 * Hp * 4 + 2 * Bp * Hp * 4 + Bp * 2 * Hp * 2
    est = w_bytes + io_bytes + state_bytes + scr_bytes
    vmem_limit = int(min(64 * 1024 * 1024, max(32 * 1024 * 1024, 2 * est)))

    cost = pl.CostEstimate(
        flops=int(2 * T_pad * Bp * 4 * Hp * (D + 3 * Hp)),
        transcendentals=int(10 * T_pad * Bp * Hp),
        bytes_accessed=int(4 * T_pad * Bp * (D + Hp) + w_bytes // 2
                           + 4 * 4 * 2 * Bp * Hp),
    )

    kernel = partial(_stack_lstm_kernel, t_true=T, tc=Tc)
    out_flat, hn_p, cn_p = pl.pallas_call(
        kernel,
        grid=(n_chunks,),
        in_specs=[
            pl.BlockSpec((Tc * Bp, D), lambda t: (t, 0)),        # x, time-chunked
            pl.BlockSpec((2, Bp, Hp), lambda t: (0, 0, 0)),      # h0 (padded)
            pl.BlockSpec((2, Bp, Hp), lambda t: (0, 0, 0)),      # c0 (padded)
            # TODO(synk): on v7x with large Hp, single-buffer these grid-invariant
            # weights (pipeline_mode=pl.Buffered(1)) or tile the 4*Hp gate axis to
            # stay under the 64 MiB VMEM ceiling.
            pl.BlockSpec((D, 4 * Hp), lambda t: (0, 0)),         # W_ih0
            pl.BlockSpec((Hp, 4 * Hp), lambda t: (0, 0)),        # W_hh0
            pl.BlockSpec((1, 4 * Hp), lambda t: (0, 0)),         # b0 (= b_ih0 + b_hh0)
            pl.BlockSpec((2 * Hp, 4 * Hp), lambda t: (0, 0)),    # [W_ih1; W_hh1]
            pl.BlockSpec((1, 4 * Hp), lambda t: (0, 0)),         # b1
        ],
        out_specs=(
            pl.BlockSpec((Tc * Bp, Hp), lambda t: (t, 0)),       # out, lane-dense
            pl.BlockSpec((2, Bp, Hp), lambda t: (0, 0, 0)),      # h_n (padded)
            pl.BlockSpec((2, Bp, Hp), lambda t: (0, 0, 0)),      # c_n (padded)
        ),
        out_shape=(
            jax.ShapeDtypeStruct((T_pad * Bp, Hp), jnp.float32),
            jax.ShapeDtypeStruct((2, Bp, Hp), jnp.float32),
            jax.ShapeDtypeStruct((2, Bp, Hp), jnp.float32),
        ),
        scratch_shapes=[
            pltpu.VMEM((Tc * Bp, 4 * Hp), jnp.float32),          # gx = x @ W_ih0 + b0
            pltpu.VMEM((2, Bp, Hp), jnp.float32),                # c state across chunks
            pltpu.VMEM((Bp, 2 * Hp), jnp.bfloat16),              # [h0 | h1] MXU operand
        ],
        # TODO(synk): on v7x, add a leading "parallel" batch-tile grid axis so the two
        # TensorCores run independent batch shards of the recurrence.
        compiler_params=pltpu.CompilerParams(
            dimension_semantics=("arbitrary",),
            vmem_limit_bytes=vmem_limit),
        cost_estimate=cost,
    )(x_p, h0_p, c0_p, wih0, whh0, b0, w1, b1)

    out = out_flat.reshape(T_pad, Bp, Hp)[:T, :B, :H]
    return out, hn_p[:, :B, :H], cn_p[:, :B, :H]


# ----------------------------------------------------------------------------- params
def _xavier_normal(key, shape):
    """Matches torch.nn.init.xavier_normal_ fan computation for >=2D tensors."""
    receptive = int(np.prod(shape[2:])) if len(shape) > 2 else 1
    fan_in = shape[1] * receptive
    fan_out = shape[0] * receptive
    std = math.sqrt(2.0 / (fan_in + fan_out))
    return std * jax.random.normal(key, shape, jnp.float32)


_GATE_PERM = (0, 1, 3, 2)   # PyTorch column order [i, f, g, o] -> kernel order [i, f, o, g]


def _prep_gate_cols(w, H, Hp):
    """(R, 4H) torch-order columns -> (R, 4*Hp): reorder gates to [i,f,o,g] and
    zero-pad each gate block to Hp lanes (128-lane aligned gate slices)."""
    R = w.shape[0]
    w4 = w.reshape(R, 4, H)[:, _GATE_PERM, :]
    w4 = jnp.pad(w4, ((0, 0), (0, 0), (0, Hp - H)))
    return w4.reshape(R, 4 * Hp)


def _pad_rows(w, rows):
    return jnp.pad(w, ((0, rows - w.shape[0]), (0, 0)))


# ----------------------------------------------------------------------------- module
class HiddenOutput:
    def __init__(self, weight):
        self.weight = weight
        self.hidden_weight = None
        self.hidden = None
        self.prev = None
        self.next = []
        self.is_top = False
        self.is_root = False


class StackLSTM:
    """JAX/Pallas port of the PyTorch StackLSTM forward pass (eval mode)."""

    def __init__(self, input_size, hidden_size, dropout, batch_size, batch_first,
                 key, bidirectional=False, time_chunk=128):
        assert not batch_first, "kernel layout is time-major (batch_first=False)"
        assert not bidirectional
        assert input_size == hidden_size, \
            "module's h_0/c_0 construction requires input_size == hidden_size"
        self.input_size = input_size
        self.hidden_size = hidden_size
        # TODO(synk): nn.LSTM inter-layer dropout applies only in training mode;
        # eval-mode forward (no dropout) is implemented here.
        self.dropout = dropout
        self.batch_size = batch_size
        self.num_layers = 2
        self.time_chunk = time_chunk
        self.root = None
        self.top = None
        self.curr_len = 0
        self.hidden_list = []

        H, D = hidden_size, input_size
        Hp = _round_up(H, 128)
        bound = 1.0 / math.sqrt(H)      # PyTorch LSTM default init U(-1/sqrt(H), 1/sqrt(H))
        keys = jax.random.split(key, 9)
        u = lambda k, s: jax.random.uniform(k, s, jnp.float32, -bound, bound)
        H4 = 4 * H
        # PyTorch-layout params, pre-transposed to (in_dim, 4H); bias = b_ih + b_hh.
        wih0 = u(keys[0], (D, H4)); whh0 = u(keys[1], (H, H4))
        b0 = u(keys[2], (1, H4)) + u(keys[3], (1, H4))
        wih1 = u(keys[4], (H, H4)); whh1 = u(keys[5], (H, H4))
        b1 = u(keys[6], (1, H4)) + u(keys[7], (1, H4))
        self.ref_params = (wih0, whh0, b0, wih1, whh1, b1)   # f32, for reference checks

        # Kernel-layout params: gate columns reordered to [i,f,o,g] and zero-padded to
        # Hp lanes; W_hh rows zero-padded to Hp; layer-1 weights stacked so the fused
        # [h0 | h1] operand hits [W_ih1; W_hh1]; bf16 MXU operands.
        # TODO(synk): keep the recurrent weights in f32 if bf16 drift over very long
        # sequences must match PyTorch f32 more tightly.
        self.k_wih0 = _prep_gate_cols(wih0, H, Hp).astype(jnp.bfloat16)               # (D, 4Hp)
        self.k_whh0 = _pad_rows(_prep_gate_cols(whh0, H, Hp), Hp).astype(jnp.bfloat16)
        self.k_b0 = _prep_gate_cols(b0, H, Hp)                                        # (1, 4Hp) f32
        self.k_w1 = jnp.concatenate(
            [_pad_rows(_prep_gate_cols(wih1, H, Hp), Hp),
             _pad_rows(_prep_gate_cols(whh1, H, Hp), Hp)], axis=0).astype(jnp.bfloat16)
        self.k_b1 = _prep_gate_cols(b1, H, Hp)
        self._state_key = keys[8]
        self._last_init_state = None

    def push(self, x, first=False):
        item = HiddenOutput(x)
        if first:
            self.top = item
            item.is_root = True
        else:
            item.prev = self.top
            self.top.next.append(x)   # matches the PyTorch module's bookkeeping
            self.top = item
        self.curr_len += 1

    def pop(self):
        try:
            self.top = self.top.prev
        except Exception:
            self.top = self.top

    def forward(self, x, first=False):
        self.push(x, first)
        if self.top.prev is None:
            # h_0/c_0 ~ xavier_normal, shape (num_layers, x.shape[1], x.shape[2])
            k1, k2, self._state_key = jax.random.split(self._state_key, 3)
            shp = (self.num_layers, x.shape[1], x.shape[2])
            h0 = _xavier_normal(k1, shp)
            c0 = _xavier_normal(k2, shp)
            self._last_init_state = (h0, c0)
        else:
            h0, c0 = self.top.prev.hidden
        out, hn, cn = lstm_forward(self.top.weight, h0, c0,
                                   self.k_wih0, self.k_whh0, self.k_b0,
                                   self.k_w1, self.k_b1,
                                   time_chunk=self.time_chunk)
        self.top.hidden = (hn, cn)
        return out


# ----------------------------------------------------------------------------- check
def _reference_lstm(x, h0, c0, params):
    """Pure-JAX f32 reference for the 2-layer LSTM forward (eval mode)."""
    wih0, whh0, b0, wih1, whh1, b1 = params

    def cell(x_t, h, c, wih, whh, b):
        gates = x_t @ wih + h @ whh + b
        Hh = h.shape[-1]
        i = jax.nn.sigmoid(gates[:, :Hh])
        f = jax.nn.sigmoid(gates[:, Hh:2 * Hh])
        g = jnp.tanh(gates[:, 2 * Hh:3 * Hh])
        o = jax.nn.sigmoid(gates[:, 3 * Hh:])
        c = f * c + i * g
        return o * jnp.tanh(c), c

    h = [h0[0], h0[1]]
    c = [c0[0], c0[1]]
    outs = []
    for t in range(x.shape[0]):
        h[0], c[0] = cell(x[t], h[0], c[0], wih0, whh0, b0)
        h[1], c[1] = cell(h[0], h[1], c[1], wih1, whh1, b1)
        outs.append(h[1])
    return jnp.stack(outs), jnp.stack(h), jnp.stack(c)


if __name__ == "__main__":
    key = jax.random.PRNGKey(0)
    k_x, k_x2, k_mod = jax.random.split(key, 3)

    T, B, H = 8, 2, 32  # seq=8, batch=2, input_size=hidden_size=32
    x = jax.random.normal(k_x, (T, B, H), jnp.float32)

    # time_chunk=3 does not divide T=8 -> exercises the padded-tail masking path
    # (grid of 3 time chunks, last chunk has one padded step).
    model = StackLSTM(input_size=H, hidden_size=H, dropout=0.0, batch_size=B,
                      batch_first=False, key=k_mod, time_chunk=3)

    out1 = jax.block_until_ready(model.forward(x, first=True))
    assert out1.shape == (T, B, H) and out1.dtype == jnp.float32
    hn1, cn1 = model.top.hidden
    assert hn1.shape == (2, B, H) and cn1.shape == (2, B, H)

    # correctness vs pure-JAX f32 reference (bf16 MXU operands -> loose tolerance)
    h0, c0 = model._last_init_state
    ref_out1, ref_hn1, ref_cn1 = _reference_lstm(x, h0, c0, model.ref_params)
    np.testing.assert_allclose(np.asarray(out1), np.asarray(ref_out1), atol=5e-2, rtol=0)
    np.testing.assert_allclose(np.asarray(hn1), np.asarray(ref_hn1), atol=5e-2, rtol=0)
    np.testing.assert_allclose(np.asarray(cn1), np.asarray(ref_cn1), atol=1e-1, rtol=0)

    # second push uses the previous step's hidden state (stack semantics)
    x2 = jax.random.normal(k_x2, (T, B, H), jnp.float32)
    out2 = jax.block_until_ready(model.forward(x2))
    assert out2.shape == (T, B, H)
    ref_out2, _, _ = _reference_lstm(x2, hn1, cn1, model.ref_params)
    np.testing.assert_allclose(np.asarray(out2), np.asarray(ref_out2), atol=5e-2, rtol=0)

    print("KERNEL_OK")
</pallas_src>

<mosaic_0001>
module attributes {stable_mosaic.version = 11 : i64} {
  func.func @_stack_lstm_kernel(%arg0: i32, %arg1: memref<24x32xf32, #tpu.memory_space<vmem>>, %arg2: memref<2x8x128xf32, #tpu.memory_space<vmem>>, %arg3: memref<2x8x128xf32, #tpu.memory_space<vmem>>, %arg4: memref<32x512xbf16, #tpu.memory_space<vmem>>, %arg5: memref<128x512xbf16, #tpu.memory_space<vmem>>, %arg6: memref<1x512xf32, #tpu.memory_space<vmem>>, %arg7: memref<256x512xbf16, #tpu.memory_space<vmem>>, %arg8: memref<1x512xf32, #tpu.memory_space<vmem>>, %arg9: memref<24x128xf32, #tpu.memory_space<vmem>>, %arg10: memref<2x8x128xf32, #tpu.memory_space<vmem>>, %arg11: memref<2x8x128xf32, #tpu.memory_space<vmem>>, %arg12: memref<24x512xf32, #tpu.memory_space<vmem>>, %arg13: memref<2x8x128xf32, #tpu.memory_space<vmem>>, %arg14: memref<8x256xbf16, #tpu.memory_space<vmem>>) attributes {dimension_semantics = [#tpu.dimension_semantics<arbitrary>], iteration_bounds = array<i64: 3>, scalar_prefetch = 0 : i64, scratch_operands = 3 : i64, tpu.core_type = #tpu.core_type<tc>, window_params = [{transform_indices = @transform_0, window_bounds = array<i64: 24, 32>}, {pipeline_mode = #tpu.pipeline_mode<synchronous>, transform_indices = @transform_1, window_bounds = array<i64: 2, 8, 128>}, {pipeline_mode = #tpu.pipeline_mode<synchronous>, transform_indices = @transform_2, window_bounds = array<i64: 2, 8, 128>}, {pipeline_mode = #tpu.pipeline_mode<synchronous>, transform_indices = @transform_3, window_bounds = array<i64: 32, 512>}, {pipeline_mode = #tpu.pipeline_mode<synchronous>, transform_indices = @transform_4, window_bounds = array<i64: 128, 512>}, {pipeline_mode = #tpu.pipeline_mode<synchronous>, transform_indices = @transform_5, window_bounds = array<i64: 1, 512>}, {pipeline_mode = #tpu.pipeline_mode<synchronous>, transform_indices = @transform_6, window_bounds = array<i64: 256, 512>}, {pipeline_mode = #tpu.pipeline_mode<synchronous>, transform_indices = @transform_7, window_bounds = array<i64: 1, 512>}, {transform_indices = @transform_8, window_bounds = array<i64: 24, 128>}, {pipeline_mode = #tpu.pipeline_mode<synchronous>, transform_indices = @transform_9, window_bounds = array<i64: 2, 8, 128>}, {pipeline_mode = #tpu.pipeline_mode<synchronous>, transform_indices = @transform_10, window_bounds = array<i64: 2, 8, 128>}]} {
    %c0_i32 = arith.constant 0 : i32
    %0 = arith.cmpi eq, %arg0, %c0_i32 : i32
    %1 = arith.extui %0 : i1 to i32
    %c0_i32_0 = arith.constant 0 : i32
    %2 = arith.cmpi ne, %1, %c0_i32_0 : i32
    scf.if %2 {
      %c0_75 = arith.constant 0 : index
      %c0_76 = arith.constant 0 : index
      %c0_77 = arith.constant 0 : index
      %183 = vector.load %arg3[%c0_75, %c0_76, %c0_77] : memref<2x8x128xf32, #tpu.memory_space<vmem>>, vector<2x8x128xf32>
      %c0_78 = arith.constant 0 : index
      %c0_79 = arith.constant 0 : index
      %c0_80 = arith.constant 0 : index
      %184 = vector.load %arg13[%c0_78, %c0_79, %c0_80] : memref<2x8x128xf32, #tpu.memory_space<vmem>>, vector<2x8x128xf32>
      tpu.vector_store %arg13[%c0_78, %c0_79, %c0_80], %183 {strides = array<i32>} : memref<2x8x128xf32, #tpu.memory_space<vmem>>, vector<2x8x128xf32>,
      %c0_81 = arith.constant 0 : index
      %c0_82 = arith.constant 0 : index
      %c0_83 = arith.constant 0 : index
      %185 = vector.load %arg2[%c0_81, %c0_82, %c0_83] : memref<2x8x128xf32, #tpu.memory_space<vmem>>, vector<1x8x128xf32>
      %186 = vector.shape_cast %185 : vector<1x8x128xf32> to vector<8x128xf32>
      %187 = arith.truncf %186 : vector<8x128xf32> to vector<8x128xbf16>
      %c0_84 = arith.constant 0 : index
      %c0_85 = arith.constant 0 : index
      %188 = vector.load %arg14[%c0_84, %c0_85] : memref<8x256xbf16, #tpu.memory_space<vmem>>, vector<8x128xbf16>
      tpu.vector_store %arg14[%c0_84, %c0_85], %187 {strides = array<i32>} : memref<8x256xbf16, #tpu.memory_space<vmem>>, vector<8x128xbf16>,
      %c1_86 = arith.constant 1 : index
      %c0_87 = arith.constant 0 : index
      %c0_88 = arith.constant 0 : index
      %189 = vector.load %arg2[%c1_86, %c0_87, %c0_88] : memref<2x8x128xf32, #tpu.memory_space<vmem>>, vector<1x8x128xf32>
      %190 = vector.shape_cast %189 : vector<1x8x128xf32> to vector<8x128xf32>
      %191 = arith.truncf %190 : vector<8x128xf32> to vector<8x128xbf16>
      %c0_89 = arith.constant 0 : index
      %c128_90 = arith.constant 128 : index
      %192 = vector.load %arg14[%c0_89, %c128_90] : memref<8x256xbf16, #tpu.memory_space<vmem>>, vector<8x128xbf16>
      tpu.vector_store %arg14[%c0_89, %c128_90], %191 {strides = array<i32>} : memref<8x256xbf16, #tpu.memory_space<vmem>>, vector<8x128xbf16>,
    } else {
    }
    %c0 = arith.constant 0 : index
    %c0_1 = arith.constant 0 : index
    %3 = vector.load %arg5[%c0, %c0_1] : memref<128x512xbf16, #tpu.memory_space<vmem>>, vector<128x512xbf16>
    %c0_2 = arith.constant 0 : index
    %c0_3 = arith.constant 0 : index
    %4 = vector.load %arg7[%c0_2, %c0_3] : memref<256x512xbf16, #tpu.memory_space<vmem>>, vector<256x512xbf16>
    %c0_4 = arith.constant 0 : index
    %c0_5 = arith.constant 0 : index
    %5 = vector.load %arg8[%c0_4, %c0_5] : memref<1x512xf32, #tpu.memory_space<vmem>>, vector<1x512xf32>
    %6 = vector.shape_cast %5 : vector<1x512xf32> to vector<1x512xf32>
    %7 = vector.broadcast %6 : vector<1x512xf32> to vector<8x512xf32>
    %c0_6 = arith.constant 0 : index
    %c0_7 = arith.constant 0 : index
    %8 = vector.load %arg1[%c0_6, %c0_7] : memref<24x32xf32, #tpu.memory_space<vmem>>, vector<24x32xf32>
    %9 = arith.truncf %8 : vector<24x32xf32> to vector<24x32xbf16>
    %c0_8 = arith.constant 0 : index
    %c0_9 = arith.constant 0 : index
    %10 = vector.load %arg4[%c0_8, %c0_9] : memref<32x512xbf16, #tpu.memory_space<vmem>>, vector<32x512xbf16>
    %cst = arith.constant dense<0.000000e+00> : vector<24x512xf32>
    %11 = tpu.matmul %9, %10, %cst {dimension_numbers = #tpu.dot_dimension_numbers<[1], [0], [0], [1], [0, 0, 1, 1], [], []>} : vector<24x32xbf16>, vector<32x512xbf16>, vector<24x512xf32> -> vector<24x512xf32>
    %c0_10 = arith.constant 0 : index
    %c0_11 = arith.constant 0 : index
    %12 = vector.load %arg6[%c0_10, %c0_11] : memref<1x512xf32, #tpu.memory_space<vmem>>, vector<1x512xf32>
    %13 = vector.broadcast %12 : vector<1x512xf32> to vector<24x512xf32>
    %14 = arith.addf %11, %13 : vector<24x512xf32>
    %c0_12 = arith.constant 0 : index
    %c0_13 = arith.constant 0 : index
    %15 = vector.load %arg12[%c0_12, %c0_13] : memref<24x512xf32, #tpu.memory_space<vmem>>, vector<24x512xf32>
    tpu.vector_store %arg12[%c0_12, %c0_13], %14 {strides = array<i32>} : memref<24x512xf32, #tpu.memory_space<vmem>>, vector<24x512xf32>,
    %c3_i32 = arith.constant 3 : i32
    %16 = arith.muli %arg0, %c3_i32 : i32
    %c0_14 = arith.constant 0 : index
    %c0_15 = arith.constant 0 : index
    %c0_16 = arith.constant 0 : index
    %17 = vector.load %arg13[%c0_14, %c0_15, %c0_16] : memref<2x8x128xf32, #tpu.memory_space<vmem>>, vector<1x8x128xf32>
    %18 = vector.shape_cast %17 : vector<1x8x128xf32> to vector<8x128xf32>
    %c1 = arith.constant 1 : index
    %c0_17 = arith.constant 0 : index
    %c0_18 = arith.constant 0 : index
    %19 = vector.load %arg13[%c1, %c0_17, %c0_18] : memref<2x8x128xf32, #tpu.memory_space<vmem>>, vector<1x8x128xf32>
    %20 = vector.shape_cast %19 : vector<1x8x128xf32> to vector<8x128xf32>
    %c0_i32_19 = arith.constant 0 : i32
    %c8_i32 = arith.constant 8 : i32
    %21 = arith.muli %c0_i32_19, %c8_i32 : i32
    %22 = tpu.assume_multiple %21, 8 : i32
    %c0_20 = arith.constant 0 : index
    %c0_21 = arith.constant 0 : index
    %23 = vector.load %arg14[%c0_20, %c0_21] : memref<8x256xbf16, #tpu.memory_space<vmem>>, vector<8x128xbf16>
    %cst_22 = arith.constant dense<0.000000e+00> : vector<8x512xf32>
    %24 = tpu.matmul %23, %3, %cst_22 {dimension_numbers = #tpu.dot_dimension_numbers<[1], [0], [0], [1], [0, 0, 1, 1], [], []>} : vector<8x128xbf16>, vector<128x512xbf16>, vector<8x512xf32> -> vector<8x512xf32>
    %25 = arith.index_cast %22 : i32 to index
    %c0_23 = arith.constant 0 : index
    %26 = vector.load %arg12[%25, %c0_23] : memref<24x512xf32, #tpu.memory_space<vmem>>, vector<8x512xf32>
    %27 = arith.addf %24, %26 : vector<8x512xf32>
    %28 = vector.extract_strided_slice %27 {offsets = [0, 0], sizes = [8, 384], strides = [1, 1]} : vector<8x512xf32> to vector<8x384xf32>
    %29 = arith.negf %28 : vector<8x384xf32>
    %30 = math.exp %29 : vector<8x384xf32>
    %cst_24 = arith.constant 1.000000e+00 : f32
    %31 = vector.broadcast %cst_24 : f32 to vector<8x384xf32>
    %32 = arith.addf %31, %30 : vector<8x384xf32>
    %33 = arith.divf %31, %32 : vector<8x384xf32>
    %34 = vector.extract_strided_slice %33 {offsets = [0, 0], sizes = [8, 128], strides = [1, 1]} : vector<8x384xf32> to vector<8x128xf32>
    %35 = vector.extract_strided_slice %33 {offsets = [0, 128], sizes = [8, 128], strides = [1, 1]} : vector<8x384xf32> to vector<8x128xf32>
    %36 = vector.extract_strided_slice %33 {offsets = [0, 256], sizes = [8, 128], strides = [1, 1]} : vector<8x384xf32> to vector<8x128xf32>
    %37 = vector.extract_strided_slice %27 {offsets = [0, 384], sizes = [8, 128], strides = [1, 1]} : vector<8x512xf32> to vector<8x128xf32>
    %38 = math.tanh %37 : vector<8x128xf32>
    %39 = arith.mulf %35, %18 : vector<8x128xf32>
    %40 = arith.mulf %34, %38 : vector<8x128xf32>
    %41 = arith.addf %39, %40 : vector<8x128xf32>
    %42 = math.tanh %41 : vector<8x128xf32>
    %43 = arith.mulf %36, %42 : vector<8x128xf32>
    %44 = arith.truncf %43 : vector<8x128xf32> to vector<8x128xbf16>
    %c0_25 = arith.constant 0 : index
    %c0_26 = arith.constant 0 : index
    %45 = vector.load %arg14[%c0_25, %c0_26] : memref<8x256xbf16, #tpu.memory_space<vmem>>, vector<8x128xbf16>
    tpu.vector_store %arg14[%c0_25, %c0_26], %44 {strides = array<i32>} : memref<8x256xbf16, #tpu.memory_space<vmem>>, vector<8x128xbf16>,
    %c0_27 = arith.constant 0 : index
    %c0_28 = arith.constant 0 : index
    %46 = vector.load %arg14[%c0_27, %c0_28] : memref<8x256xbf16, #tpu.memory_space<vmem>>, vector<8x256xbf16>
    %cst_29 = arith.constant dense<0.000000e+00> : vector<8x512xf32>
    %47 = tpu.matmul %46, %4, %cst_29 {dimension_numbers = #tpu.dot_dimension_numbers<[1], [0], [0], [1], [0, 0, 1, 1], [], []>} : vector<8x256xbf16>, vector<256x512xbf16>, vector<8x512xf32> -> vector<8x512xf32>
    %48 = arith.addf %47, %7 : vector<8x512xf32>
    %49 = vector.extract_strided_slice %48 {offsets = [0, 0], sizes = [8, 384], strides = [1, 1]} : vector<8x512xf32> to vector<8x384xf32>
    %50 = arith.negf %49 : vector<8x384xf32>
    %51 = math.exp %50 : vector<8x384xf32>
    %cst_30 = arith.constant 1.000000e+00 : f32
    %52 = vector.broadcast %cst_30 : f32 to vector<8x384xf32>
    %53 = arith.addf %52, %51 : vector<8x384xf32>
    %54 = arith.divf %52, %53 : vector<8x384xf32>
    %55 = vector.extract_strided_slice %54 {offsets = [0, 0], sizes = [8, 128], strides = [1, 1]} : vector<8x384xf32> to vector<8x128xf32>
    %56 = vector.extract_strided_slice %54 {offsets = [0, 128], sizes = [8, 128], strides = [1, 1]} : vector<8x384xf32> to vector<8x128xf32>
    %57 = vector.extract_strided_slice %54 {offsets = [0, 256], sizes = [8, 128], strides = [1, 1]} : vector<8x384xf32> to vector<8x128xf32>
    %58 = vector.extract_strided_slice %48 {offsets = [0, 384], sizes = [8, 128], strides = [1, 1]} : vector<8x512xf32> to vector<8x128xf32>
    %59 = math.tanh %58 : vector<8x128xf32>
    %60 = arith.mulf %56, %20 : vector<8x128xf32>
    %61 = arith.mulf %55, %59 : vector<8x128xf32>
    %62 = arith.addf %60, %61 : vector<8x128xf32>
    %63 = math.tanh %62 : vector<8x128xf32>
    %64 = arith.mulf %57, %63 : vector<8x128xf32>
    %65 = arith.truncf %64 : vector<8x128xf32> to vector<8x128xbf16>
    %c0_31 = arith.constant 0 : index
    %c128 = arith.constant 128 : index
    %66 = vector.load %arg14[%c0_31, %c128] : memref<8x256xbf16, #tpu.memory_space<vmem>>, vector<8x128xbf16>
    tpu.vector_store %arg14[%c0_31, %c128], %65 {strides = array<i32>} : memref<8x256xbf16, #tpu.memory_space<vmem>>, vector<8x128xbf16>,
    %67 = arith.index_cast %22 : i32 to index
    %c0_32 = arith.constant 0 : index
    %68 = vector.load %arg9[%67, %c0_32] : memref<24x128xf32, #tpu.memory_space<vmem>>, vector<8x128xf32>
    tpu.vector_store %arg9[%67, %c0_32], %64 {strides = array<i32>} : memref<24x128xf32, #tpu.memory_space<vmem>>, vector<8x128xf32>,
    %69 = arith.addi %16, %c0_i32_19 : i32
    %c7_i32 = arith.constant 7 : i32
    %70 = arith.cmpi eq, %69, %c7_i32 : i32
    %71 = arith.extui %70 : i1 to i32
    %c0_i32_33 = arith.constant 0 : i32
    %72 = arith.cmpi ne, %71, %c0_i32_33 : i32
    scf.if %72 {
      %c0_75 = arith.constant 0 : index
      %c0_76 = arith.constant 0 : index
      %c0_77 = arith.constant 0 : index
      %183 = vector.load %arg10[%c0_75, %c0_76, %c0_77] : memref<2x8x128xf32, #tpu.memory_space<vmem>>, vector<1x8x128xf32>
      %184 = vector.shape_cast %183 : vector<1x8x128xf32> to vector<8x128xf32>
      %185 = vector.shape_cast %43 : vector<8x128xf32> to vector<1x8x128xf32>
      tpu.vector_store %arg10[%c0_75, %c0_76, %c0_77], %185 {strides = array<i32>} : memref<2x8x128xf32, #tpu.memory_space<vmem>>, vector<1x8x128xf32>,
      %c1_78 = arith.constant 1 : index
      %c0_79 = arith.constant 0 : index
      %c0_80 = arith.constant 0 : index
      %186 = vector.load %arg10[%c1_78, %c0_79, %c0_80] : memref<2x8x128xf32, #tpu.memory_space<vmem>>, vector<1x8x128xf32>
      %187 = vector.shape_cast %186 : vector<1x8x128xf32> to vector<8x128xf32>
      %188 = vector.shape_cast %64 : vector<8x128xf32> to vector<1x8x128xf32>
      tpu.vector_store %arg10[%c1_78, %c0_79, %c0_80], %188 {strides = array<i32>} : memref<2x8x128xf32, #tpu.memory_space<vmem>>, vector<1x8x128xf32>,
      %c0_81 = arith.constant 0 : index
      %c0_82 = arith.constant 0 : index
      %c0_83 = arith.constant 0 : index
      %189 = vector.load %arg11[%c0_81, %c0_82, %c0_83] : memref<2x8x128xf32, #tpu.memory_space<vmem>>, vector<1x8x128xf32>
      %190 = vector.shape_cast %189 : vector<1x8x128xf32> to vector<8x128xf32>
      %191 = vector.shape_cast %41 : vector<8x128xf32> to vector<1x8x128xf32>
      tpu.vector_store %arg11[%c0_81, %c0_82, %c0_83], %191 {strides = array<i32>} : memref<2x8x128xf32, #tpu.memory_space<vmem>>, vector<1x8x128xf32>,
      %c1_84 = arith.constant 1 : index
      %c0_85 = arith.constant 0 : index
      %c0_86 = arith.constant 0 : index
      %192 = vector.load %arg11[%c1_84, %c0_85, %c0_86] : memref<2x8x128xf32, #tpu.memory_space<vmem>>, vector<1x8x128xf32>
      %193 = vector.shape_cast %192 : vector<1x8x128xf32> to vector<8x128xf32>
      %194 = vector.shape_cast %62 : vector<8x128xf32> to vector<1x8x128xf32>
      tpu.vector_store %arg11[%c1_84, %c0_85, %c0_86], %194 {strides = array<i32>} : memref<2x8x128xf32, #tpu.memory_space<vmem>>, vector<1x8x128xf32>,
    } else {
    }
    %c1_i32 = arith.constant 1 : i32
    %c8_i32_34 = arith.constant 8 : i32
    %73 = arith.muli %c1_i32, %c8_i32_34 : i32
    %74 = tpu.assume_multiple %73, 8 : i32
    %c0_35 = arith.constant 0 : index
    %c0_36 = arith.constant 0 : index
    %75 = vector.load %arg14[%c0_35, %c0_36] : memref<8x256xbf16, #tpu.memory_space<vmem>>, vector<8x128xbf16>
    %cst_37 = arith.constant dense<0.000000e+00> : vector<8x512xf32>
    %76 = tpu.matmul %75, %3, %cst_37 {dimension_numbers = #tpu.dot_dimension_numbers<[1], [0], [0], [1], [0, 0, 1, 1], [], []>} : vector<8x128xbf16>, vector<128x512xbf16>, vector<8x512xf32> -> vector<8x512xf32>
    %77 = arith.index_cast %74 : i32 to index
    %c0_38 = arith.constant 0 : index
    %78 = vector.load %arg12[%77, %c0_38] : memref<24x512xf32, #tpu.memory_space<vmem>>, vector<8x512xf32>
    %79 = arith.addf %76, %78 : vector<8x512xf32>
    %80 = vector.extract_strided_slice %79 {offsets = [0, 0], sizes = [8, 384], strides = [1, 1]} : vector<8x512xf32> to vector<8x384xf32>
    %81 = arith.negf %80 : vector<8x384xf32>
    %82 = math.exp %81 : vector<8x384xf32>
    %cst_39 = arith.constant 1.000000e+00 : f32
    %83 = vector.broadcast %cst_39 : f32 to vector<8x384xf32>
    %84 = arith.addf %83, %82 : vector<8x384xf32>
    %85 = arith.divf %83, %84 : vector<8x384xf32>
    %86 = vector.extract_strided_slice %85 {offsets = [0, 0], sizes = [8, 128], strides = [1, 1]} : vector<8x384xf32> to vector<8x128xf32>
    %87 = vector.extract_strided_slice %85 {offsets = [0, 128], sizes = [8, 128], strides = [1, 1]} : vector<8x384xf32> to vector<8x128xf32>
    %88 = vector.extract_strided_slice %85 {offsets = [0, 256], sizes = [8, 128], strides = [1, 1]} : vector<8x384xf32> to vector<8x128xf32>
    %89 = vector.extract_strided_slice %79 {offsets = [0, 384], sizes = [8, 128], strides = [1, 1]} : vector<8x512xf32> to vector<8x128xf32>
    %90 = math.tanh %89 : vector<8x128xf32>
    %91 = arith.mulf %87, %41 : vector<8x128xf32>
    %92 = arith.mulf %86, %90 : vector<8x128xf32>
    %93 = arith.addf %91, %92 : vector<8x128xf32>
    %94 = math.tanh %93 : vector<8x128xf32>
    %95 = arith.mulf %88, %94 : vector<8x128xf32>
    %96 = arith.truncf %95 : vector<8x128xf32> to vector<8x128xbf16>
    %c0_40 = arith.constant 0 : index
    %c0_41 = arith.constant 0 : index
    %97 = vector.load %arg14[%c0_40, %c0_41] : memref<8x256xbf16, #tpu.memory_space<vmem>>, vector<8x128xbf16>
    tpu.vector_store %arg14[%c0_40, %c0_41], %96 {strides = array<i32>} : memref<8x256xbf16, #tpu.memory_space<vmem>>, vector<8x128xbf16>,
    %c0_42 = arith.constant 0 : index
    %c0_43 = arith.constant 0 : index
    %98 = vector.load %arg14[%c0_42, %c0_43] : memref<8x256xbf16, #tpu.memory_space<vmem>>, vector<8x256xbf16>
    %cst_44 = arith.constant dense<0.000000e+00> : vector<8x512xf32>
    %99 = tpu.matmul %98, %4, %cst_44 {dimension_numbers = #tpu.dot_dimension_numbers<[1], [0], [0], [1], [0, 0, 1, 1], [], []>} : vector<8x256xbf16>, vector<256x512xbf16>, vector<8x512xf32> -> vector<8x512xf32>
    %100 = arith.addf %99, %7 : vector<8x512xf32>
    %101 = vector.extract_strided_slice %100 {offsets = [0, 0], sizes = [8, 384], strides = [1, 1]} : vector<8x512xf32> to vector<8x384xf32>
    %102 = arith.negf %101 : vector<8x384xf32>
    %103 = math.exp %102 : vector<8x384xf32>
    %cst_45 = arith.constant 1.000000e+00 : f32
    %104 = vector.broadcast %cst_45 : f32 to vector<8x384xf32>
    %105 = arith.addf %104, %103 : vector<8x384xf32>
    %106 = arith.divf %104, %105 : vector<8x384xf32>
    %107 = vector.extract_strided_slice %106 {offsets = [0, 0], sizes = [8, 128], strides = [1, 1]} : vector<8x384xf32> to vector<8x128xf32>
    %108 = vector.extract_strided_slice %106 {offsets = [0, 128], sizes = [8, 128], strides = [1, 1]} : vector<8x384xf32> to vector<8x128xf32>
    %109 = vector.extract_strided_slice %106 {offsets = [0, 256], sizes = [8, 128], strides = [1, 1]} : vector<8x384xf32> to vector<8x128xf32>
    %110 = vector.extract_strided_slice %100 {offsets = [0, 384], sizes = [8, 128], strides = [1, 1]} : vector<8x512xf32> to vector<8x128xf32>
    %111 = math.tanh %110 : vector<8x128xf32>
    %112 = arith.mulf %108, %62 : vector<8x128xf32>
    %113 = arith.mulf %107, %111 : vector<8x128xf32>
    %114 = arith.addf %112, %113 : vector<8x128xf32>
    %115 = math.tanh %114 : vector<8x128xf32>
    %116 = arith.mulf %109, %115 : vector<8x128xf32>
    %117 = arith.truncf %116 : vector<8x128xf32> to vector<8x128xbf16>
    %c0_46 = arith.constant 0 : index
    %c128_47 = arith.constant 128 : index
    %118 = vector.load %arg14[%c0_46, %c128_47] : memref<8x256xbf16, #tpu.memory_space<vmem>>, vector<8x128xbf16>
    tpu.vector_store %arg14[%c0_46, %c128_47], %117 {strides = array<i32>} : memref<8x256xbf16, #tpu.memory_space<vmem>>, vector<8x128xbf16>,
    %119 = arith.index_cast %74 : i32 to index
    %c0_48 = arith.constant 0 : index
    %120 = vector.load %arg9[%119, %c0_48] : memref<24x128xf32, #tpu.memory_space<vmem>>, vector<8x128xf32>
    tpu.vector_store %arg9[%119, %c0_48], %116 {strides = array<i32>} : memref<24x128xf32, #tpu.memory_space<vmem>>, vector<8x128xf32>,
    %121 = arith.addi %16, %c1_i32 : i32
    %c7_i32_49 = arith.constant 7 : i32
    %122 = arith.cmpi eq, %121, %c7_i32_49 : i32
    %123 = arith.extui %122 : i1 to i32
    %c0_i32_50 = arith.constant 0 : i32
    %124 = arith.cmpi ne, %123, %c0_i32_50 : i32
    scf.if %124 {
      %c0_75 = arith.constant 0 : index
      %c0_76 = arith.constant 0 : index
      %c0_77 = arith.constant 0 : index
      %183 = vector.load %arg10[%c0_75, %c0_76, %c0_77] : memref<2x8x128xf32, #tpu.memory_space<vmem>>, vector<1x8x128xf32>
      %184 = vector.shape_cast %183 : vector<1x8x128xf32> to vector<8x128xf32>
      %185 = vector.shape_cast %95 : vector<8x128xf32> to vector<1x8x128xf32>
      tpu.vector_store %arg10[%c0_75, %c0_76, %c0_77], %185 {strides = array<i32>} : memref<2x8x128xf32, #tpu.memory_space<vmem>>, vector<1x8x128xf32>,
      %c1_78 = arith.constant 1 : index
      %c0_79 = arith.constant 0 : index
      %c0_80 = arith.constant 0 : index
      %186 = vector.load %arg10[%c1_78, %c0_79, %c0_80] : memref<2x8x128xf32, #tpu.memory_space<vmem>>, vector<1x8x128xf32>
      %187 = vector.shape_cast %186 : vector<1x8x128xf32> to vector<8x128xf32>
      %188 = vector.shape_cast %116 : vector<8x128xf32> to vector<1x8x128xf32>
      tpu.vector_store %arg10[%c1_78, %c0_79, %c0_80], %188 {strides = array<i32>} : memref<2x8x128xf32, #tpu.memory_space<vmem>>, vector<1x8x128xf32>,
      %c0_81 = arith.constant 0 : index
      %c0_82 = arith.constant 0 : index
      %c0_83 = arith.constant 0 : index
      %189 = vector.load %arg11[%c0_81, %c0_82, %c0_83] : memref<2x8x128xf32, #tpu.memory_space<vmem>>, vector<1x8x128xf32>
      %190 = vector.shape_cast %189 : vector<1x8x128xf32> to vector<8x128xf32>
      %191 = vector.shape_cast %93 : vector<8x128xf32> to vector<1x8x128xf32>
      tpu.vector_store %arg11[%c0_81, %c0_82, %c0_83], %191 {strides = array<i32>} : memref<2x8x128xf32, #tpu.memory_space<vmem>>, vector<1x8x128xf32>,
      %c1_84 = arith.constant 1 : index
      %c0_85 = arith.constant 0 : index
      %c0_86 = arith.constant 0 : index
      %192 = vector.load %arg11[%c1_84, %c0_85, %c0_86] : memref<2x8x128xf32, #tpu.memory_space<vmem>>, vector<1x8x128xf32>
      %193 = vector.shape_cast %192 : vector<1x8x128xf32> to vector<8x128xf32>
      %194 = vector.shape_cast %114 : vector<8x128xf32> to vector<1x8x128xf32>
      tpu.vector_store %arg11[%c1_84, %c0_85, %c0_86], %194 {strides = array<i32>} : memref<2x8x128xf32, #tpu.memory_space<vmem>>, vector<1x8x128xf32>,
    } else {
    }
    %c2_i32 = arith.constant 2 : i32
    %c8_i32_51 = arith.constant 8 : i32
    %125 = arith.muli %c2_i32, %c8_i32_51 : i32
    %126 = tpu.assume_multiple %125, 8 : i32
    %c0_52 = arith.constant 0 : index
    %c0_53 = arith.constant 0 : index
    %127 = vector.load %arg14[%c0_52, %c0_53] : memref<8x256xbf16, #tpu.memory_space<vmem>>, vector<8x128xbf16>
    %cst_54 = arith.constant dense<0.000000e+00> : vector<8x512xf32>
    %128 = tpu.matmul %127, %3, %cst_54 {dimension_numbers = #tpu.dot_dimension_numbers<[1], [0], [0], [1], [0, 0, 1, 1], [], []>} : vector<8x128xbf16>, vector<128x512xbf16>, vector<8x512xf32> -> vector<8x512xf32>
    %129 = arith.index_cast %126 : i32 to index
    %c0_55 = arith.constant 0 : index
    %130 = vector.load %arg12[%129, %c0_55] : memref<24x512xf32, #tpu.memory_space<vmem>>, vector<8x512xf32>
    %131 = arith.addf %128, %130 : vector<8x512xf32>
    %132 = vector.extract_strided_slice %131 {offsets = [0, 0], sizes = [8, 384], strides = [1, 1]} : vector<8x512xf32> to vector<8x384xf32>
    %133 = arith.negf %132 : vector<8x384xf32>
    %134 = math.exp %133 : vector<8x384xf32>
    %cst_56 = arith.constant 1.000000e+00 : f32
    %135 = vector.broadcast %cst_56 : f32 to vector<8x384xf32>
    %136 = arith.addf %135, %134 : vector<8x384xf32>
    %137 = arith.divf %135, %136 : vector<8x384xf32>
    %138 = vector.extract_strided_slice %137 {offsets = [0, 0], sizes = [8, 128], strides = [1, 1]} : vector<8x384xf32> to vector<8x128xf32>
    %139 = vector.extract_strided_slice %137 {offsets = [0, 128], sizes = [8, 128], strides = [1, 1]} : vector<8x384xf32> to vector<8x128xf32>
    %140 = vector.extract_strided_slice %137 {offsets = [0, 256], sizes = [8, 128], strides = [1, 1]} : vector<8x384xf32> to vector<8x128xf32>
    %141 = vector.extract_strided_slice %131 {offsets = [0, 384], sizes = [8, 128], strides = [1, 1]} : vector<8x512xf32> to vector<8x128xf32>
    %142 = math.tanh %141 : vector<8x128xf32>
    %143 = arith.mulf %139, %93 : vector<8x128xf32>
    %144 = arith.mulf %138, %142 : vector<8x128xf32>
    %145 = arith.addf %143, %144 : vector<8x128xf32>
    %146 = math.tanh %145 : vector<8x128xf32>
    %147 = arith.mulf %140, %146 : vector<8x128xf32>
    %148 = arith.truncf %147 : vector<8x128xf32> to vector<8x128xbf16>
    %c0_57 = arith.constant 0 : index
    %c0_58 = arith.constant 0 : index
    %149 = vector.load %arg14[%c0_57, %c0_58] : memref<8x256xbf16, #tpu.memory_space<vmem>>, vector<8x128xbf16>
    tpu.vector_store %arg14[%c0_57, %c0_58], %148 {strides = array<i32>} : memref<8x256xbf16, #tpu.memory_space<vmem>>, vector<8x128xbf16>,
    %c0_59 = arith.constant 0 : index
    %c0_60 = arith.constant 0 : index
    %150 = vector.load %arg14[%c0_59, %c0_60] : memref<8x256xbf16, #tpu.memory_space<vmem>>, vector<8x256xbf16>
    %cst_61 = arith.constant dense<0.000000e+00> : vector<8x512xf32>
    %151 = tpu.matmul %150, %4, %cst_61 {dimension_numbers = #tpu.dot_dimension_numbers<[1], [0], [0], [1], [0, 0, 1, 1], [], []>} : vector<8x256xbf16>, vector<256x512xbf16>, vector<8x512xf32> -> vector<8x512xf32>
    %152 = arith.addf %151, %7 : vector<8x512xf32>
    %153 = vector.extract_strided_slice %152 {offsets = [0, 0], sizes = [8, 384], strides = [1, 1]} : vector<8x512xf32> to vector<8x384xf32>
    %154 = arith.negf %153 : vector<8x384xf32>
    %155 = math.exp %154 : vector<8x384xf32>
    %cst_62 = arith.constant 1.000000e+00 : f32
    %156 = vector.broadcast %cst_62 : f32 to vector<8x384xf32>
    %157 = arith.addf %156, %155 : vector<8x384xf32>
    %158 = arith.divf %156, %157 : vector<8x384xf32>
    %159 = vector.extract_strided_slice %158 {offsets = [0, 0], sizes = [8, 128], strides = [1, 1]} : vector<8x384xf32> to vector<8x128xf32>
    %160 = vector.extract_strided_slice %158 {offsets = [0, 128], sizes = [8, 128], strides = [1, 1]} : vector<8x384xf32> to vector<8x128xf32>
    %161 = vector.extract_strided_slice %158 {offsets = [0, 256], sizes = [8, 128], strides = [1, 1]} : vector<8x384xf32> to vector<8x128xf32>
    %162 = vector.extract_strided_slice %152 {offsets = [0, 384], sizes = [8, 128], strides = [1, 1]} : vector<8x512xf32> to vector<8x128xf32>
    %163 = math.tanh %162 : vector<8x128xf32>
    %164 = arith.mulf %160, %114 : vector<8x128xf32>
    %165 = arith.mulf %159, %163 : vector<8x128xf32>
    %166 = arith.addf %164, %165 : vector<8x128xf32>
    %167 = math.tanh %166 : vector<8x128xf32>
    %168 = arith.mulf %161, %167 : vector<8x128xf32>
    %169 = arith.truncf %168 : vector<8x128xf32> to vector<8x128xbf16>
    %c0_63 = arith.constant 0 : index
    %c128_64 = arith.constant 128 : index
    %170 = vector.load %arg14[%c0_63, %c128_64] : memref<8x256xbf16, #tpu.memory_space<vmem>>, vector<8x128xbf16>
    tpu.vector_store %arg14[%c0_63, %c128_64], %169 {strides = array<i32>} : memref<8x256xbf16, #tpu.memory_space<vmem>>, vector<8x128xbf16>,
    %171 = arith.index_cast %126 : i32 to index
    %c0_65 = arith.constant 0 : index
    %172 = vector.load %arg9[%171, %c0_65] : memref<24x128xf32, #tpu.memory_space<vmem>>, vector<8x128xf32>
    tpu.vector_store %arg9[%171, %c0_65], %168 {strides = array<i32>} : memref<24x128xf32, #tpu.memory_space<vmem>>, vector<8x128xf32>,
    %173 = arith.addi %16, %c2_i32 : i32
    %c7_i32_66 = arith.constant 7 : i32
    %174 = arith.cmpi eq, %173, %c7_i32_66 : i32
    %175 = arith.extui %174 : i1 to i32
    %c0_i32_67 = arith.constant 0 : i32
    %176 = arith.cmpi ne, %175, %c0_i32_67 : i32
    scf.if %176 {
      %c0_75 = arith.constant 0 : index
      %c0_76 = arith.constant 0 : index
      %c0_77 = arith.constant 0 : index
      %183 = vector.load %arg10[%c0_75, %c0_76, %c0_77] : memref<2x8x128xf32, #tpu.memory_space<vmem>>, vector<1x8x128xf32>
      %184 = vector.shape_cast %183 : vector<1x8x128xf32> to vector<8x128xf32>
      %185 = vector.shape_cast %147 : vector<8x128xf32> to vector<1x8x128xf32>
      tpu.vector_store %arg10[%c0_75, %c0_76, %c0_77], %185 {strides = array<i32>} : memref<2x8x128xf32, #tpu.memory_space<vmem>>, vector<1x8x128xf32>,
      %c1_78 = arith.constant 1 : index
      %c0_79 = arith.constant 0 : index
      %c0_80 = arith.constant 0 : index
      %186 = vector.load %arg10[%c1_78, %c0_79, %c0_80] : memref<2x8x128xf32, #tpu.memory_space<vmem>>, vector<1x8x128xf32>
      %187 = vector.shape_cast %186 : vector<1x8x128xf32> to vector<8x128xf32>
      %188 = vector.shape_cast %168 : vector<8x128xf32> to vector<1x8x128xf32>
      tpu.vector_store %arg10[%c1_78, %c0_79, %c0_80], %188 {strides = array<i32>} : memref<2x8x128xf32, #tpu.memory_space<vmem>>, vector<1x8x128xf32>,
      %c0_81 = arith.constant 0 : index
      %c0_82 = arith.constant 0 : index
      %c0_83 = arith.constant 0 : index
      %189 = vector.load %arg11[%c0_81, %c0_82, %c0_83] : memref<2x8x128xf32, #tpu.memory_space<vmem>>, vector<1x8x128xf32>
      %190 = vector.shape_cast %189 : vector<1x8x128xf32> to vector<8x128xf32>
      %191 = vector.shape_cast %145 : vector<8x128xf32> to vector<1x8x128xf32>
      tpu.vector_store %arg11[%c0_81, %c0_82, %c0_83], %191 {strides = array<i32>} : memref<2x8x128xf32, #tpu.memory_space<vmem>>, vector<1x8x128xf32>,
      %c1_84 = arith.constant 1 : index
      %c0_85 = arith.constant 0 : index
      %c0_86 = arith.constant 0 : index
      %192 = vector.load %arg11[%c1_84, %c0_85, %c0_86] : memref<2x8x128xf32, #tpu.memory_space<vmem>>, vector<1x8x128xf32>
      %193 = vector.shape_cast %192 : vector<1x8x128xf32> to vector<8x128xf32>
      %194 = vector.shape_cast %166 : vector<8x128xf32> to vector<1x8x128xf32>
      tpu.vector_store %arg11[%c1_84, %c0_85, %c0_86], %194 {strides = array<i32>} : memref<2x8x128xf32, #tpu.memory_space<vmem>>, vector<1x8x128xf32>,
    } else {
    }
    %c3_i32_68 = arith.constant 3 : i32
    %c0_69 = arith.constant 0 : index
    %c0_70 = arith.constant 0 : index
    %c0_71 = arith.constant 0 : index
    %177 = vector.load %arg13[%c0_69, %c0_70, %c0_71] : memref<2x8x128xf32, #tpu.memory_space<vmem>>, vector<1x8x128xf32>
    %178 = vector.shape_cast %177 : vector<1x8x128xf32> to vector<8x128xf32>
    %179 = vector.shape_cast %145 : vector<8x128xf32> to vector<1x8x128xf32>
    tpu.vector_store %arg13[%c0_69, %c0_70, %c0_71], %179 {strides = array<i32>} : memref<2x8x128xf32, #tpu.memory_space<vmem>>, vector<1x8x128xf32>,
    %c1_72 = arith.constant 1 : index
    %c0_73 = arith.constant 0 : index
    %c0_74 = arith.constant 0 : index
    %180 = vector.load %arg13[%c1_72, %c0_73, %c0_74] : memref<2x8x128xf32, #tpu.memory_space<vmem>>, vector<1x8x128xf32>
    %181 = vector.shape_cast %180 : vector<1x8x128xf32> to vector<8x128xf32>
    %182 = vector.shape_cast %166 : vector<8x128xf32> to vector<1x8x128xf32>
    tpu.vector_store %arg13[%c1_72, %c0_73, %c0_74], %182 {strides = array<i32>} : memref<2x8x128xf32, #tpu.memory_space<vmem>>, vector<1x8x128xf32>,
    return
  }
  func.func @transform_0(%arg0: i32) -> (i32, i32) {
    %c0_i32 = arith.constant 0 : i32
    %c0_i32_0 = arith.constant 0 : i32
    return %arg0, %c0_i32 : i32, i32
  }
  func.func @transform_1(%arg0: i32) -> (i32, i32, i32) {
    %c0_i32 = arith.constant 0 : i32
    %c0_i32_0 = arith.constant 0 : i32
    %c0_i32_1 = arith.constant 0 : i32
    %c0_i32_2 = arith.constant 0 : i32
    return %c0_i32, %c0_i32_0, %c0_i32_1 : i32, i32, i32
  }
  func.func @transform_2(%arg0: i32) -> (i32, i32, i32) {
    %c0_i32 = arith.constant 0 : i32
    %c0_i32_0 = arith.constant 0 : i32
    %c0_i32_1 = arith.constant 0 : i32
    %c0_i32_2 = arith.constant 0 : i32
    return %c0_i32, %c0_i32_0, %c0_i32_1 : i32, i32, i32
  }
  func.func @transform_3(%arg0: i32) -> (i32, i32) {
    %c0_i32 = arith.constant 0 : i32
    %c0_i32_0 = arith.constant 0 : i32
    %c0_i32_1 = arith.constant 0 : i32
    return %c0_i32, %c0_i32_0 : i32, i32
  }
  func.func @transform_4(%arg0: i32) -> (i32, i32) {
    %c0_i32 = arith.constant 0 : i32
    %c0_i32_0 = arith.constant 0 : i32
    %c0_i32_1 = arith.constant 0 : i32
    return %c0_i32, %c0_i32_0 : i32, i32
  }
  func.func @transform_5(%arg0: i32) -> (i32, i32) {
    %c0_i32 = arith.constant 0 : i32
    %c0_i32_0 = arith.constant 0 : i32
    %c0_i32_1 = arith.constant 0 : i32
    return %c0_i32, %c0_i32_0 : i32, i32
  }
  func.func @transform_6(%arg0: i32) -> (i32, i32) {
    %c0_i32 = arith.constant 0 : i32
    %c0_i32_0 = arith.constant 0 : i32
    %c0_i32_1 = arith.constant 0 : i32
    return %c0_i32, %c0_i32_0 : i32, i32
  }
  func.func @transform_7(%arg0: i32) -> (i32, i32) {
    %c0_i32 = arith.constant 0 : i32
    %c0_i32_0 = arith.constant 0 : i32
    %c0_i32_1 = arith.constant 0 : i32
    return %c0_i32, %c0_i32_0 : i32, i32
  }
  func.func @transform_8(%arg0: i32) -> (i32, i32) {
    %c0_i32 = arith.constant 0 : i32
    %c0_i32_0 = arith.constant 0 : i32
    return %arg0, %c0_i32 : i32, i32
  }
  func.func @transform_9(%arg0: i32) -> (i32, i32, i32) {
    %c0_i32 = arith.constant 0 : i32
    %c0_i32_0 = arith.constant 0 : i32
    %c0_i32_1 = arith.constant 0 : i32
    %c0_i32_2 = arith.constant 0 : i32
    return %c0_i32, %c0_i32_0, %c0_i32_1 : i32, i32, i32
  }
  func.func @transform_10(%arg0: i32) -> (i32, i32, i32) {
    %c0_i32 = arith.constant 0 : i32
    %c0_i32_0 = arith.constant 0 : i32
    %c0_i32_1 = arith.constant 0 : i32
    %c0_i32_2 = arith.constant 0 : i32
    return %c0_i32, %c0_i32_0, %c0_i32_1 : i32, i32, i32
  }
}

</mosaic_0001>

<bundles_post_ra>
// kernel: lstm_forward.1
= control target key start
LH: loop header
LB: loop body
LE: loop exit
PB: predicated region body
PF: predicated region fallthrough
CT: control target
= control target key end

     0   :  { %16 = vsyncpa [#allocation6], 0  ;;  %s3404_s0 = inlined_call_operand.vmem [shape: f32[72,32], index: 0, kind: input, shape index: {}]   ;;  %s3405_s1 = inlined_call_operand.vmem [shape: f32[2,8,128], index: 1, kind: input, shape index: {}]   ;;  %s3406_s2 = inlined_call_operand.vmem [shape: f32[2,8,128], index: 2, kind: input, shape index: {}]   ;;  %s3407_s3 = inlined_call_operand.vmem [shape: bf16[32,512], index: 3, kind: input, shape index: {}]   ;;  %s3408_s4 = inlined_call_operand.hbm [shape: bf16[128,512], index: 4, kind: input, shape index: {}]   ;;  %s3409_s5 = inlined_call_operand.vmem [shape: f32[1,512], index: 5, kind: input, shape index: {}]   ;;  %s3410_s6 = inlined_call_operand.hbm [shape: bf16[256,512], index: 6, kind: input, shape index: {}]   ;;  %s3411_s7 = inlined_call_operand.vmem [shape: f32[1,512], index: 7, kind: input, shape index: {}]   ;;  %s3412_s8 = inlined_call_operand.vmem [shape: f32[72,128], index: 8, kind: output, shape index: {0}]   ;;  %s3413_s9 = inlined_call_operand.vmem [shape: f32[2,8,128], index: 9, kind: output, shape index: {1}]   ;;  %s3414_s10 = inlined_call_operand.vmem [shape: f32[2,8,128], index: 10, kind: output, shape index: {2}]  }
   0x1   :  { %17 = vsyncpa [#allocation8], 0  ;;  %s2634_s13 = smov 0  }
   0x2 LB: > { %s2640_s14 = sadd.s32 4294967295, %s2572_s13   ;;  %p2031_p0 = scmp.ge.s32.totalorder %s2572_s13, 1  ;;  %s2572_s13 = sphi %s2634_s13, %s23_s13  }
   0x3   : > { %p269_p1 = scmp.lt.s32.totalorder %s2572_s13, 4  ;;  %s2574_s15 = smov [#allocation5]  }
   0x4   : > { %s290_s16 = sshll.u32 %s2574_s15, 4  ;;  %p3415_p4 = scmp.eq.s32.totalorder %s2640_s14, 0  ;;  %s291_s16 = int_to_ptr.vmem [resolvable:$true] %s290_s16 }
   0x5   : > { %p2645_p3 = pnand %p2031_p0, %p269_p1  ;;  %s2575_s18 = smov [#allocation7]  }
   0x6   : > { %s306_s19 = sshll.u32 %s2575_s18, 4  ;;  %s2502_s23 = scalar_lea.hbm %s3408_s4, 4096  ;;  %s2658_s19 = int_to_ptr.vmem [resolvable:$true] %s306_s19 }
   0x7   : > { %s3483_s17 = scalar_select %p2645_p3, 1, 0 }
   0x8   : > { %p2220_p5 = pneg %p2645_p3  ;;  %p2503_p7 = scmp.ne.s32.totalorder %s3408_s4, %s2502_s23 }
   0x9   : > { %p2509_p11 = scmp.lt.u32.totalorder %s2502_s23, %s3408_s4 }
   0xa   : > { %p2654_p6 = pnand %p3415_p4, %p2220_p5 }
   0xc   : > { %p2504_p8 = pneg %p2654_p6 }
   0xe   : > { %p2505_p9 = pnand %p2504_p8, %p2503_p7 }
  0x10   : > { %p2506_p10 = pneg %p2505_p9 }
  0x12   : > { %p2511_p12 = pnand %p2509_p11, %p2506_p10 }
  0x14   : > { %2514 = shalt.err (!%p2511_p12)
}
  0x15   : > { %s2515_s28 = scalar_lea.vmem %s291_s16, 4096  ;;  %p2523_p5 = scmp.lt.s32.totalorder %s291_s16, %s291_s16 }
  0x16   : > { %p2516_p13 = scmp.ne.s32.totalorder %s291_s16, %s2515_s28  ;;  %p2524_p2 = scmp.lt.s32.totalorder %s2515_s28, %s2515_s28 }
  0x18   : > { %p2518_p0 = pnand %p2516_p13, %p2504_p8  ;;  %p2525_p4 = por %p2524_p2, %p2523_p5 }
  0x1a   : > { %p2519_p1 = pneg %p2518_p0 }
  0x1c   : > { %p2526_p3 = pnand %p2525_p4, %p2519_p1 }
  0x1e   : > { %2529 = shalt.err (!%p2526_p3)
}
  0x1f   : > { %s2576_s29 = smov 256   ;;  %s2577_s30 = smov 16  }
  0x20   : > { %2223 = dma.hbm_to_vmem [thread:$0]  (!%p2654_p6), %s3408_s4, 4096, %s291_s16, [#allocation6], %s2576_s29, %s2576_s29, %s2577_s30  }
  0x21   : > { %s2530_s21 = scalar_lea.hbm %s3410_s6, 8192 }
  0x22   : > { %p2531_p7 = scmp.ne.s32.totalorder %s3410_s6, %s2530_s21  ;;  %p2537_p4 = scmp.lt.u32.totalorder %s2530_s21, %s3410_s6 }
  0x24   : > { %p2533_p2 = pnand %p2531_p7, %p2504_p8 }
  0x26   : > { %p2534_p3 = pneg %p2533_p2 }
  0x28   : > { %p2539_p9 = pnand %p2537_p4, %p2534_p3 }
  0x2a   : > { %2542 = shalt.err (!%p2539_p9)
}
  0x2b   : > { %s2543_s16 = scalar_lea.vmem %s2658_s19, 8192  ;;  %p2551_p13 = scmp.lt.s32.totalorder %s2658_s19, %s2658_s19 }
  0x2c   : > { %p2544_p10 = scmp.ne.s32.totalorder %s2658_s19, %s2543_s16  ;;  %p2552_p0 = scmp.lt.s32.totalorder %s2543_s16, %s2543_s16 }
  0x2e   : > { %p2546_p11 = pnand %p2544_p10, %p2504_p8  ;;  %p2553_p1 = por %p2552_p0, %p2551_p13 }
  0x30   : > { %p2547_p12 = pneg %p2546_p11 }
  0x32   : > { %p2554_p5 = pnand %p2553_p1, %p2547_p12 }
  0x34   : > { %2557 = shalt.err (!%p2554_p5)
}
  0x35   : > { %2226 = dma.hbm_to_vmem [thread:$0]  (!%p2654_p6), %s3410_s6, 8192, %s2658_s19, [#allocation8], %s2576_s29, %s2576_s29, %s2577_s30  }
  0x36   : > { %p3485_p7 = scmp.ne.s32.totalorder %s3483_s17, 0 }
  0x38   : > { %334 = sbr.rel (%p3485_p7) target bundleno = 1781 (0x6f5), region = 52 }
  0x3f   : > { %p3486_p2 = scmp.eq.s32.totalorder %s2640_s14, 0 }
  0x41   : > { %2563 = dma.done.wait (%p3486_p2), [#allocation6], 4096   ;;  %p3487_p8 = pmov %p3486_p2 }
  0x42   : > { %p3488_p3 = pmov %p3486_p2 }
  0x43   : > { %2565 = vsyncadd (%p3487_p8), [#allocation6], 4294963200 }
  0x44   : > { %2567 = dma.done.wait (%p3488_p3), [#allocation8], 8192   ;;  %p3489_p4 = pmov %p3486_p2 }
  0x45   : > { %s2718_s20 = smul.u32 3, %s2640_s14  ;;  %p3490_p9 = scmp.ne.s32.totalorder %s2640_s14, 0 }
  0x46   : > { %2569 = vsyncadd (%p3489_p4), [#allocation8], 4294959104  ;;  %v393_v0 = vld [vmem:[%s3406_s2] sm:$0xff] (!%p3490_p9)  ;;  %v394_v1 = vld [vmem:[%s3406_s2 + $0x8] sm:$0xff] (!%p3490_p9) }
  0x47   : > { %p377_p6 = scmp.lt.s32.totalorder %s2718_s20, 8  ;;  %392 = sbr.rel (%p3490_p9) target bundleno = 78 (0x4e), region = 64  ;;  %v397_v2 = vld [vmem:[%s3405_s1] sm:$0xff] (!%p3490_p9)  ;;  %395 = vst [vmem:[#allocation3] sm:$0xff] (!%p3490_p9), %v393_v0  ;;  %396 = vst [vmem:[#allocation3 + $0x8] sm:$0xff] (!%p3490_p9), %v394_v1  ;;  %v2041_v3 = vld [vmem:[%s3405_s1 + $0x8] sm:$0xff] (!%p3490_p9) }
  0x48   : > { %v2190_v4 = vpack.c.bf16 (!%p3490_p9), %v2041_v3, %v397_v2 }
  0x49   : > { %s378_s17 = scalar_select %p377_p6, %s2718_s20, 8 }
  0x4a   : > { %2191 = vst [vmem:[#allocation4] sm:$0xff] (!%p3490_p9), %v2190_v4  }
  0x4b   : > { %s2038_s19 = sshll.u32 %s378_s17, 3 }
  0x4c   : > { %s2725_s30 = scalar_lea.vmem %s3404_s0, %s2038_s19  ;;  %s2730_s15 = scalar_lea.vmem %s3412_s8, %s2038_s19 }
  0x4e PF: > { %v2244_v5 = vld [vmem:[%s3407_s3 + $0x4] ss:$16 sps:$4 sm:$0xff]   ;;  %v2246_v6 = vld [vmem:[%s3407_s3 + $0xc] ss:$16 sps:$4 sm:$0xff]   ;;  %v3417_v7 = vmov 0   ;;  %vm597_vm0 = vcmask 261120   ;;  %v502_v31 = vlaneseq }
  0x4f   : > { %636 = vmatprep.mubr.bf16.mxu0 %v3417_v7  ;;  %687 = vmatprep.mubr.bf16.mxu1 %v3417_v7  ;;  %v2248_v8 = vld [vmem:[%s3407_s3] ss:$16 sps:$4 sm:$0xff]   ;;  %v2249_v9 = vld [vmem:[%s3407_s3 + $0x8] ss:$16 sps:$4 sm:$0xff]   ;;  %v2250_v10 = vld [vmem:[%s3407_s3 + $0x24] ss:$16 sps:$4 sm:$0xff]  }
  0x50   : > { %604 = vmatprep.subr.bf16.mxu0 %v2244_v5  ;;  %655 = vmatprep.subr.bf16.mxu1 %v2246_v6  ;;  %v2252_v11 = vld [vmem:[%s3407_s3 + $0x2c] ss:$16 sps:$4 sm:$0xff]   ;;  %v2254_v12 = vld [vmem:[%s3407_s3 + $0x20] ss:$16 sps:$4 sm:$0xff]   ;;  %v2255_v13 = vld [vmem:[%s3407_s3 + $0x28] ss:$16 sps:$4 sm:$0xff]  }
  0x51   : > { %605 = vmatpush1.bf16.msra.mxu0 %v2248_v8  ;;  %656 = vmatpush1.bf16.msra.mxu1 %v2249_v9  ;;  %v522_v14 = vld [vmem:[%s2725_s30] sm:$0xff]  ;;  %v523_v15 = vld [vmem:[%s2725_s30 + $0x8] sm:$0xff]  ;;  %v2828_v36 = vshrl.u32 %v502_v31, 7  ;;  %v524_v37 = vld [vmem:[%s2725_s30 + $0x10] sm:$0xff]  ;;  %p2158_p10 = scmp.ne.s32.totalorder %s2718_s20, 7 }
  0x52   : > { %606 = vmatprep.subr.bf16.mxu0 %v2250_v10  ;;  %657 = vmatprep.subr.bf16.mxu1 %v2252_v11  ;;  %v2774_v16 = vld [vmem:[#allocation5] ss:$16 sps:$4 sm:$0xff]   ;;  %v525_v17 = vpack.c.bf16 %v523_v15, %v522_v14  ;;  %v2776_v18 = vld [vmem:[#allocation5 + $0x4] ss:$16 sps:$4 sm:$0xff]   ;;  %v2778_v19 = vld [vmem:[#allocation5 + $0x8] ss:$16 sps:$4 sm:$0xff]   ;;  %v526_v39 = vpack.c.bf16 %v524_v37, %v524_v37 }
  0x53   : > { %v2780_v20 = vld [vmem:[#allocation5 + $0xc] ss:$16 sps:$4 sm:$0xff]   ;;  %v2783_v21 = vld [vmem:[#allocation5 + $0x24] ss:$16 sps:$4 sm:$0xff]   ;;  %v2792_v23 = vld [vmem:[#allocation5 + $0x20] ss:$16 sps:$4 sm:$0xff]  }
  0x54   : > { %v2788_v22 = vld [vmem:[#allocation5 + $0x2c] ss:$16 sps:$4 sm:$0xff]   ;;  %v2794_v24 = vld [vmem:[#allocation5 + $0x28] ss:$16 sps:$4 sm:$0xff]   ;;  %v2798_v25 = vld [vmem:[#allocation5 + $0x44] ss:$16 sps:$4 sm:$0xff]  }
  0x55   : > { %607 = vmatpush1.bf16.msra.mxu0 %v2254_v12  ;;  %658 = vmatpush1.bf16.msra.mxu1 %v2255_v13  ;;  %v2800_v26 = vld [vmem:[#allocation5 + $0x4c] ss:$16 sps:$4 sm:$0xff]   ;;  %v2806_v27 = vld [vmem:[#allocation5 + $0x40] ss:$16 sps:$4 sm:$0xff]   ;;  %v2808_v28 = vld [vmem:[#allocation5 + $0x48] ss:$16 sps:$4 sm:$0xff]  }
  0x56   : > { %890 = vmatprep.subr.bf16.mxu0 %v2776_v18  ;;  %931 = vmatprep.subr.bf16.mxu1 %v2780_v20  ;;  %v2812_v29 = vld [vmem:[#allocation5 + $0x64] ss:$16 sps:$4 sm:$0xff]   ;;  %v2814_v30 = vld [vmem:[#allocation5 + $0x6c] ss:$16 sps:$4 sm:$0xff]   ;;  %v2818_v32 = vld [vmem:[#allocation5 + $0x60] ss:$16 sps:$4 sm:$0xff]  }
  0x57   : > { %v2820_v33 = vld [vmem:[#allocation5 + $0x68] ss:$16 sps:$4 sm:$0xff]   ;;  %v2824_v34 = vld [vmem:[#allocation5 + $0x84] ss:$16 sps:$4 sm:$0xff]   ;;  %v2826_v35 = vld [vmem:[#allocation5 + $0x8c] ss:$16 sps:$4 sm:$0xff]  }
  0x58   : > { %2050 = vmatmul.mubr.msk.bf16.vlgmr.msra.gmra.mrb[0].mxu0 %vm597_vm0, %v525_v17  ;;  %2052 = vmatmul.mubr.msk.bf16.vlgmr.msra.gmra.mrb[0].mxu1 %vm597_vm0, %v525_v17  ;;  %v2831_v38 = vld [vmem:[#allocation5 + $0x80] ss:$16 sps:$4 sm:$0xff]   ;;  %v2835_v40 = vld [vmem:[#allocation5 + $0x88] ss:$16 sps:$4 sm:$0xff]   ;;  %v2837_v41 = vld [vmem:[#allocation5 + $0xa4] ss:$16 sps:$4 sm:$0xff]  }
  0x59   : > { %891 = vmatpush1.bf16.msra.mxu0 %v2774_v16  ;;  %932 = vmatpush1.bf16.msra.mxu1 %v2778_v19  ;;  %v2841_v42 = vld [vmem:[#allocation5 + $0xac] ss:$16 sps:$4 sm:$0xff]   ;;  %v3423_v43 = vsub.s32 0, %v2828_v36  ;;  %v2844_v44 = vld [vmem:[#allocation5 + $0xa0] ss:$16 sps:$4 sm:$0xff]   ;;  %v3422_v57 = vsub.s32 1, %v2828_v36 }
  0x5a   : > { %892 = vmatprep.subr.bf16.mxu0 %v2783_v21  ;;  %933 = vmatprep.subr.bf16.mxu1 %v2788_v22  ;;  %v2848_v45 = vld [vmem:[#allocation5 + $0xa8] ss:$16 sps:$4 sm:$0xff]   ;;  %v2850_v46 = vld [vmem:[#allocation5 + $0xc4] ss:$16 sps:$4 sm:$0xff]   ;;  %v2852_v47 = vld [vmem:[#allocation5 + $0xcc] ss:$16 sps:$4 sm:$0xff]  }
  0x5b   : > { %646 = vmatprep.mubr.bf16.mxu0 %v3417_v7  ;;  %697 = vmatprep.mubr.bf16.mxu1 %v3417_v7  ;;  %v535_v48 = vld [vmem:[%s3409_s5] sm:$0xf]  ;;  %v2867_v50 = vld [vmem:[#allocation5 + $0xc0] ss:$16 sps:$4 sm:$0xff]   ;;  %v2871_v52 = vld [vmem:[#allocation5 + $0xe4] ss:$16 sps:$4 sm:$0xff]  }
  0x5c   : > { %v2865_v49 = vrot.slane %v535_v48, %v3423_v43  ;;  %v2869_v51 = vld [vmem:[#allocation5 + $0xc8] ss:$16 sps:$4 sm:$0xff]   ;;  %v2873_v53 = vld [vmem:[#allocation5 + $0xec] ss:$16 sps:$4 sm:$0xff]   ;;  %v2880_v54 = vld [vmem:[#allocation5 + $0xe0] ss:$16 sps:$4 sm:$0xff]   ;;  %v2893_v58 = vrot.slane %v535_v48, %v3422_v57 }
  0x5d   : > { %893 = vmatpush1.bf16.msra.mxu0 %v2792_v23  ;;  %934 = vmatpush1.bf16.msra.mxu1 %v2794_v24  ;;  %v2882_v55 = vld [vmem:[#allocation5 + $0xe8] ss:$16 sps:$4 sm:$0xff]   ;;  %v3421_v59 = vsub.s32 2, %v2828_v36  ;;  %v3420_v60 = vsub.s32 3, %v2828_v36  ;;  %v2898_v61 = vld [vmem:[#allocation7] ss:$16 sps:$4 sm:$0xff]  }
  0x5e   : > { %894 = vmatprep.subr.bf16.mxu0 %v2798_v25  ;;  %935 = vmatprep.subr.bf16.mxu1 %v2800_v26  ;;  %2192 = vst [vmem:[#allocation2 + $0x40] sm:$0xff] %v2865_v49  ;;  %v722_v56 = vld [vmem:[#allocation4] sm:$0xf]  ;;  %2195 = vst [vmem:[#allocation2 + $0x48] sm:$0xff] %v2893_v58  ;;  %v2900_v62 = vld [vmem:[#allocation7 + $0x4] ss:$16 sps:$4 sm:$0xff]  }
  0x5f   : > { %v2902_v63 = vld [vmem:[#allocation7 + $0x8] ss:$16 sps:$4 sm:$0xff]   ;;  %v2904_v0 = vld [vmem:[#allocation7 + $0xc] ss:$16 sps:$4 sm:$0xff]   ;;  %v2908_v1 = vrot.slane %v535_v48, %v3421_v59  ;;  %v2912_v2 = vrot.slane %v535_v48, %v3420_v60  ;;  %v2920_v3 = vld [vmem:[#allocation7 + $0x24] ss:$16 sps:$4 sm:$0xff]  }
  0x60   : > { %2051 = vmatmul.mubr.msk.bf16.gmra.mrb[4].mxu0 %vm597_vm0, %v526_v39  ;;  %2053 = vmatmul.mubr.msk.bf16.gmra.mrb[4].mxu1 %vm597_vm0, %v526_v39  ;;  %v2922_v4 = vld [vmem:[#allocation7 + $0x2c] ss:$16 sps:$4 sm:$0xff]   ;;  %v2924_v5 = vld [vmem:[#allocation7 + $0x20] ss:$16 sps:$4 sm:$0xff]   ;;  %v2926_v6 = vld [vmem:[#allocation7 + $0x28] ss:$16 sps:$4 sm:$0xff]  }
  0x61   : > { %895 = vmatpush1.bf16.msra.mxu0 %v2806_v27  ;;  %936 = vmatpush1.bf16.msra.mxu1 %v2808_v28  ;;  %2198 = vst [vmem:[#allocation2 + $0x50] sm:$0xff] %v2908_v1  ;;  %2201 = vst [vmem:[#allocation2 + $0x58] sm:$0xff] %v2912_v2  ;;  %v2932_v8 = vld [vmem:[#allocation7 + $0x44] ss:$16 sps:$4 sm:$0xff]   ;;  %v2934_v9 = vld [vmem:[#allocation7 + $0x4c] ss:$16 sps:$4 sm:$0xff]  }
  0x62   : > { %896 = vmatprep.subr.bf16.mxu0 %v2812_v29  ;;  %937 = vmatprep.subr.bf16.mxu1 %v2814_v30  ;;  %3491 = vst [vmem:[#allocation11_spill] sm:$0xff] %v2922_v4  ;;  %3492 = vst [vmem:[#allocation12_spill] sm:$0xff] %v2924_v5  ;;  %v2936_v10 = vld [vmem:[#allocation7 + $0x40] ss:$16 sps:$4 sm:$0xff]   ;;  %v2938_v11 = vld [vmem:[#allocation7 + $0x48] ss:$16 sps:$4 sm:$0xff]  }
  0x63   : > { %922 = vmatprep.mubr.bf16.mxu0 %v3417_v7  ;;  %963 = vmatprep.mubr.bf16.mxu1 %v3417_v7  ;;  %3493 = vst [vmem:[#allocation13_spill] sm:$0xff] %v2926_v6  ;;  %3494 = vst [vmem:[#allocation14_spill] sm:$0xff] %v2932_v8  ;;  %v2944_v12 = vld [vmem:[#allocation7 + $0x64] ss:$16 sps:$4 sm:$0xff]   ;;  %v2946_v13 = vld [vmem:[#allocation7 + $0x6c] ss:$16 sps:$4 sm:$0xff]  }
  0x64   : > { %3495 = vst [vmem:[#allocation15_spill] sm:$0xff] %v2934_v9  ;;  %3496 = vst [vmem:[#allocation16_spill] sm:$0xff] %v2936_v10  ;;  %v2948_v14 = vld [vmem:[#allocation7 + $0x60] ss:$16 sps:$4 sm:$0xff]   ;;  %v2950_v15 = vld [vmem:[#allocation7 + $0x68] ss:$16 sps:$4 sm:$0xff]  }
  0x65   : > { %897 = vmatpush1.bf16.msra.mxu0 %v2818_v32  ;;  %938 = vmatpush1.bf16.msra.mxu1 %v2820_v33  ;;  %3497 = vst [vmem:[#allocation17_spill] sm:$0xff] %v2938_v11  ;;  %3498 = vst [vmem:[#allocation18_spill] sm:$0xff] %v2944_v12  ;;  %v2956_v17 = vld [vmem:[#allocation7 + $0x84] ss:$16 sps:$4 sm:$0xff]   ;;  %v2958_v31 = vld [vmem:[#allocation7 + $0x8c] ss:$16 sps:$4 sm:$0xff]  }
  0x66   : > { %898 = vmatprep.subr.bf16.mxu0 %v2824_v34  ;;  %939 = vmatprep.subr.bf16.mxu1 %v2826_v35  ;;  %3499 = vst [vmem:[#allocation19_spill] sm:$0xff] %v2946_v13  ;;  %3500 = vst [vmem:[#allocation20_spill] sm:$0xff] %v2948_v14  ;;  %v2960_v37 = vld [vmem:[#allocation7 + $0x80] ss:$16 sps:$4 sm:$0xff]   ;;  %v2962_v39 = vld [vmem:[#allocation7 + $0x88] ss:$16 sps:$4 sm:$0xff]  }
  0x67   : > { %3501 = vst [vmem:[#allocation21_spill] sm:$0xff] %v2950_v15  ;;  %3502 = vst [vmem:[#allocation22_spill] sm:$0xff] %v2956_v17  ;;  %v2968_v48 = vld [vmem:[#allocation7 + $0xa4] ss:$16 sps:$4 sm:$0xff]   ;;  %v2972_v7 = vld [vmem:[#allocation7 + $0xa0] ss:$16 sps:$4 sm:$0xff]  }
  0x68   : > { %3503 = vst [vmem:[#allocation23_spill] sm:$0xff] %v2958_v31  ;;  %3504 = vst [vmem:[#allocation24_spill] sm:$0xff] %v2960_v37  ;;  %v2974_v60 = vld [vmem:[#allocation7 + $0xa8] ss:$16 sps:$4 sm:$0xff]   ;;  %v2980_v59 = vld [vmem:[#allocation7 + $0xc4] ss:$16 sps:$4 sm:$0xff]  }
  0x69   : > { %899 = vmatpush1.bf16.msra.mxu0 %v2831_v38  ;;  %940 = vmatpush1.bf16.msra.mxu1 %v2835_v40  ;;  %3505 = vst [vmem:[#allocation25_spill] sm:$0xff] %v2962_v39  ;;  %3506 = vst [vmem:[#allocation26_spill] sm:$0xff] %v2968_v48  ;;  %v2982_v57 = vld [vmem:[#allocation7 + $0xcc] ss:$16 sps:$4 sm:$0xff]   ;;  %v2984_v43 = vld [vmem:[#allocation7 + $0xc0] ss:$16 sps:$4 sm:$0xff]  }
  0x6a   : > { %900 = vmatprep.subr.bf16.mxu0 %v2837_v41  ;;  %941 = vmatprep.subr.bf16.mxu1 %v2841_v42  ;;  %3508 = vst [vmem:[#allocation28_spill] sm:$0xff] %v2972_v7  ;;  %3509 = vst [vmem:[#allocation29_spill] sm:$0xff] %v2974_v60 }
  0x6b   : > { %3510 = vst [vmem:[#allocation30_spill] sm:$0xff] %v2980_v59  ;;  %3511 = vst [vmem:[#allocation31_spill] sm:$0xff] %v2982_v57 }
  0x6c   : > { %3512 = vst [vmem:[#allocation32_spill] sm:$0xff] %v2984_v43 }
  0x6d   : > { %901 = vmatpush1.bf16.msra.mxu0 %v2844_v44  ;;  %942 = vmatpush1.bf16.msra.mxu1 %v2848_v45 }
  0x6e   : > { %902 = vmatprep.subr.bf16.mxu0 %v2850_v46  ;;  %943 = vmatprep.subr.bf16.mxu1 %v2852_v47 }
  0x71   : > { %903 = vmatpush1.bf16.msra.mxu0 %v2867_v50  ;;  %944 = vmatpush1.bf16.msra.mxu1 %v2869_v51 }
  0x72   : > { %904 = vmatprep.subr.bf16.mxu0 %v2871_v52  ;;  %945 = vmatprep.subr.bf16.mxu1 %v2873_v53 }
  0x75   : > { %905 = vmatpush1.bf16.msra.mxu0 %v2880_v54  ;;  %946 = vmatpush1.bf16.msra.mxu1 %v2882_v55 }
  0x76   : > { %1326 = vmatprep.subr.bf16.mxu0 %v2900_v62  ;;  %1367 = vmatprep.subr.bf16.mxu1 %v2904_v0 }
  0x78   : > { %923 = vmatmul.mubr.bf16.vlgmr.msra.gmra.mrb[8].mxu0 %v722_v56  ;;  %964 = vmatmul.mubr.bf16.vlgmr.msra.gmra.mrb[8].mxu1 %v722_v56  ;;  %v2970_v56 = vld [vmem:[#allocation7 + $0xac] ss:$16 sps:$4 sm:$0xff]  }
  0x79   : > { %1327 = vmatpush1.bf16.msra.mxu0 %v2898_v61  ;;  %1368 = vmatpush1.bf16.msra.mxu1 %v2902_v63  ;;  %3507 = vst [vmem:[#allocation27_spill] sm:$0xff] %v2970_v56 }
  0x7a   : > { %1328 = vmatprep.subr.bf16.mxu0 %v2920_v3  ;;  %1369 = vmatprep.subr.bf16.mxu1 %v2922_v4 }
  0x7d   : > { %1329 = vmatpush1.bf16.msra.mxu0 %v2924_v5  ;;  %1370 = vmatpush1.bf16.msra.mxu1 %v2926_v6 }
  0x7e   : > { %1330 = vmatprep.subr.bf16.mxu0 %v2932_v8  ;;  %1371 = vmatprep.subr.bf16.mxu1 %v2934_v9 }
  0x81   : > { %1331 = vmatpush1.bf16.msra.mxu0 %v2936_v10  ;;  %1372 = vmatpush1.bf16.msra.mxu1 %v2938_v11 }
  0x82   : > { %1332 = vmatprep.subr.bf16.mxu0 %v2944_v12  ;;  %1373 = vmatprep.subr.bf16.mxu1 %v2946_v13 }
  0x85   : > { %1333 = vmatpush1.bf16.msra.mxu0 %v2948_v14  ;;  %1374 = vmatpush1.bf16.msra.mxu1 %v2950_v15 }
  0x86   : > { %1334 = vmatprep.subr.bf16.mxu0 %v2956_v17  ;;  %1375 = vmatprep.subr.bf16.mxu1 %v2958_v31  ;;  %v3087_v31 = vld [vmem:[#allocation7 + $0x1ec] ss:$16 sps:$4 sm:$0xff]  }
  0x87   : > { %3547 = vst [vmem:[#allocation67_spill] sm:$0xff] %v3087_v31 }
  0x89   : > { %1335 = vmatpush1.bf16.msra.mxu0 %v2960_v37  ;;  %1376 = vmatpush1.bf16.msra.mxu1 %v2962_v39  ;;  %v2986_v39 = vld [vmem:[#allocation7 + $0xc8] ss:$16 sps:$4 sm:$0xff]   ;;  %v3084_v37 = vld [vmem:[#allocation7 + $0x1e4] ss:$16 sps:$4 sm:$0xff]  }
  0x8a   : > { %1336 = vmatprep.subr.bf16.mxu0 %v2968_v48  ;;  %1377 = vmatprep.subr.bf16.mxu1 %v2970_v56  ;;  %3513 = vst [vmem:[#allocation33_spill] sm:$0xff] %v2986_v39  ;;  %v2992_v56 = vld [vmem:[#allocation7 + $0xe4] ss:$16 sps:$4 sm:$0xff]   ;;  %v2998_v48 = vld [vmem:[#allocation7 + $0xe8] ss:$16 sps:$4 sm:$0xff]   ;;  %3546 = vst [vmem:[#allocation66_spill] sm:$0xff] %v3084_v37 }
  0x8b   : > { %3514 = vst [vmem:[#allocation34_spill] sm:$0xff] %v2992_v56  ;;  %3517 = vst [vmem:[#allocation37_spill] sm:$0xff] %v2998_v48 }
  0x8d   : > { %1337 = vmatpush1.bf16.msra.mxu0 %v2972_v7  ;;  %1378 = vmatpush1.bf16.msra.mxu1 %v2974_v60  ;;  %v2994_v7 = vld [vmem:[#allocation7 + $0xec] ss:$16 sps:$4 sm:$0xff]   ;;  %v2996_v60 = vld [vmem:[#allocation7 + $0xe0] ss:$16 sps:$4 sm:$0xff]  }
  0x8e   : > { %1338 = vmatprep.subr.bf16.mxu0 %v2980_v59  ;;  %1379 = vmatprep.subr.bf16.mxu1 %v2982_v57  ;;  %3515 = vst [vmem:[#allocation35_spill] sm:$0xff] %v2994_v7  ;;  %3516 = vst [vmem:[#allocation36_spill] sm:$0xff] %v2996_v60  ;;  %v3004_v57 = vld [vmem:[#allocation7 + $0x104] ss:$16 sps:$4 sm:$0xff]   ;;  %v3010_v59 = vld [vmem:[#allocation7 + $0x108] ss:$16 sps:$4 sm:$0xff]  }
  0x8f   : > { %3518 = vst [vmem:[#allocation38_spill] sm:$0xff] %v3004_v57  ;;  %3521 = vst [vmem:[#allocation41_spill] sm:$0xff] %v3010_v59 }
  0x91   : > { %1339 = vmatpush1.bf16.msra.mxu0 %v2984_v43  ;;  %1380 = vmatpush1.bf16.msra.mxu1 %v2986_v39  ;;  %v3006_v43 = vld [vmem:[#allocation7 + $0x10c] ss:$16 sps:$4 sm:$0xff]   ;;  %v3008_v39 = vld [vmem:[#allocation7 + $0x100] ss:$16 sps:$4 sm:$0xff]  }
  0x92   : > { %1340 = vmatprep.subr.bf16.mxu0 %v2992_v56  ;;  %1381 = vmatprep.subr.bf16.mxu1 %v2994_v7  ;;  %3519 = vst [vmem:[#allocation39_spill] sm:$0xff] %v3006_v43  ;;  %3520 = vst [vmem:[#allocation40_spill] sm:$0xff] %v3008_v39  ;;  %v3016_v7 = vld [vmem:[#allocation7 + $0x124] ss:$16 sps:$4 sm:$0xff]   ;;  %v3022_v56 = vld [vmem:[#allocation7 + $0x128] ss:$16 sps:$4 sm:$0xff]  }
  0x93   : > { %3522 = vst [vmem:[#allocation42_spill] sm:$0xff] %v3016_v7  ;;  %3525 = vst [vmem:[#allocation45_spill] sm:$0xff] %v3022_v56 }
  0x95   : > { %1341 = vmatpush1.bf16.msra.mxu0 %v2996_v60  ;;  %1382 = vmatpush1.bf16.msra.mxu1 %v2998_v48  ;;  %v3018_v60 = vld [vmem:[#allocation7 + $0x12c] ss:$16 sps:$4 sm:$0xff]   ;;  %v3020_v48 = vld [vmem:[#allocation7 + $0x120] ss:$16 sps:$4 sm:$0xff]  }
  0x96   : > { %1342 = vmatprep.subr.bf16.mxu0 %v3004_v57  ;;  %1383 = vmatprep.subr.bf16.mxu1 %v3006_v43  ;;  %3523 = vst [vmem:[#allocation43_spill] sm:$0xff] %v3018_v60  ;;  %3524 = vst [vmem:[#allocation44_spill] sm:$0xff] %v3020_v48  ;;  %v3028_v43 = vld [vmem:[#allocation7 + $0x144] ss:$16 sps:$4 sm:$0xff]   ;;  %v3034_v57 = vld [vmem:[#allocation7 + $0x148] ss:$16 sps:$4 sm:$0xff]  }
  0x97   : > { %3526 = vst [vmem:[#allocation46_spill] sm:$0xff] %v3028_v43  ;;  %3529 = vst [vmem:[#allocation49_spill] sm:$0xff] %v3034_v57 }
  0x99   : > { %1343 = vmatpush1.bf16.msra.mxu0 %v3008_v39  ;;  %1384 = vmatpush1.bf16.msra.mxu1 %v3010_v59  ;;  %v3030_v39 = vld [vmem:[#allocation7 + $0x14c] ss:$16 sps:$4 sm:$0xff]   ;;  %v3032_v59 = vld [vmem:[#allocation7 + $0x140] ss:$16 sps:$4 sm:$0xff]  }
  0x9a   : > { %1344 = vmatprep.subr.bf16.mxu0 %v3016_v7  ;;  %1385 = vmatprep.subr.bf16.mxu1 %v3018_v60  ;;  %3527 = vst [vmem:[#allocation47_spill] sm:$0xff] %v3030_v39  ;;  %3528 = vst [vmem:[#allocation48_spill] sm:$0xff] %v3032_v59  ;;  %v3040_v60 = vld [vmem:[#allocation7 + $0x164] ss:$16 sps:$4 sm:$0xff]   ;;  %v3046_v7 = vld [vmem:[#allocation7 + $0x168] ss:$16 sps:$4 sm:$0xff]  }
  0x9b   : > { %3530 = vst [vmem:[#allocation50_spill] sm:$0xff] %v3040_v60  ;;  %3533 = vst [vmem:[#allocation53_spill] sm:$0xff] %v3046_v7 }
  0x9d   : > { %1345 = vmatpush1.bf16.msra.mxu0 %v3020_v48  ;;  %1386 = vmatpush1.bf16.msra.mxu1 %v3022_v56  ;;  %v3042_v48 = vld [vmem:[#allocation7 + $0x16c] ss:$16 sps:$4 sm:$0xff]   ;;  %v3044_v56 = vld [vmem:[#allocation7 + $0x160] ss:$16 sps:$4 sm:$0xff]  }
  0x9e   : > { %1346 = vmatprep.subr.bf16.mxu0 %v3028_v43  ;;  %1387 = vmatprep.subr.bf16.mxu1 %v3030_v39  ;;  %3531 = vst [vmem:[#allocation51_spill] sm:$0xff] %v3042_v48  ;;  %3532 = vst [vmem:[#allocation52_spill] sm:$0xff] %v3044_v56  ;;  %v3052_v39 = vld [vmem:[#allocation7 + $0x184] ss:$16 sps:$4 sm:$0xff]   ;;  %v3058_v43 = vld [vmem:[#allocation7 + $0x188] ss:$16 sps:$4 sm:$0xff]  }
  0x9f   : > { %3534 = vst [vmem:[#allocation54_spill] sm:$0xff] %v3052_v39  ;;  %3537 = vst [vmem:[#allocation57_spill] sm:$0xff] %v3058_v43 }
  0xa1   : > { %1347 = vmatpush1.bf16.msra.mxu0 %v3032_v59  ;;  %1388 = vmatpush1.bf16.msra.mxu1 %v3034_v57  ;;  %v3054_v59 = vld [vmem:[#allocation7 + $0x18c] ss:$16 sps:$4 sm:$0xff]   ;;  %v3056_v57 = vld [vmem:[#allocation7 + $0x180] ss:$16 sps:$4 sm:$0xff]  }
  0xa2   : > { %1348 = vmatprep.subr.bf16.mxu0 %v3040_v60  ;;  %1389 = vmatprep.subr.bf16.mxu1 %v3042_v48  ;;  %3535 = vst [vmem:[#allocation55_spill] sm:$0xff] %v3054_v59  ;;  %3536 = vst [vmem:[#allocation56_spill] sm:$0xff] %v3056_v57  ;;  %v3064_v48 = vld [vmem:[#allocation7 + $0x1a4] ss:$16 sps:$4 sm:$0xff]   ;;  %v3070_v60 = vld [vmem:[#allocation7 + $0x1a8] ss:$16 sps:$4 sm:$0xff]  }
  0xa3   : > { %3538 = vst [vmem:[#allocation58_spill] sm:$0xff] %v3064_v48  ;;  %3541 = vst [vmem:[#allocation61_spill] sm:$0xff] %v3070_v60 }
  0xa5   : > { %1349 = vmatpush1.bf16.msra.mxu0 %v3044_v56  ;;  %1390 = vmatpush1.bf16.msra.mxu1 %v3046_v7  ;;  %v3066_v56 = vld [vmem:[#allocation7 + $0x1ac] ss:$16 sps:$4 sm:$0xff]   ;;  %v3068_v7 = vld [vmem:[#allocation7 + $0x1a0] ss:$16 sps:$4 sm:$0xff]  }
  0xa6   : > { %1350 = vmatprep.subr.bf16.mxu0 %v3052_v39  ;;  %1391 = vmatprep.subr.bf16.mxu1 %v3054_v59  ;;  %3539 = vst [vmem:[#allocation59_spill] sm:$0xff] %v3066_v56  ;;  %3540 = vst [vmem:[#allocation60_spill] sm:$0xff] %v3068_v7  ;;  %v3076_v59 = vld [vmem:[#allocation7 + $0x1c0] ss:$16 sps:$4 sm:$0xff]   ;;  %v3082_v39 = vld [vmem:[#allocation7 + $0x1cc] ss:$16 sps:$4 sm:$0xff]  }
  0xa7   : > { %3542 = vst [vmem:[#allocation62_spill] sm:$0xff] %v3076_v59  ;;  %3545 = vst [vmem:[#allocation65_spill] sm:$0xff] %v3082_v39 }
  0xa9   : > { %1351 = vmatpush1.bf16.msra.mxu0 %v3056_v57  ;;  %1392 = vmatpush1.bf16.msra.mxu1 %v3058_v43  ;;  %v3078_v57 = vld [vmem:[#allocation7 + $0x1c4] ss:$16 sps:$4 sm:$0xff]   ;;  %v3080_v43 = vld [vmem:[#allocation7 + $0x1c8] ss:$16 sps:$4 sm:$0xff]  }
  0xaa   : > { %1352 = vmatprep.subr.bf16.mxu0 %v3064_v48  ;;  %1393 = vmatprep.subr.bf16.mxu1 %v3066_v56  ;;  %3543 = vst [vmem:[#allocation63_spill] sm:$0xff] %v3078_v57  ;;  %3544 = vst [vmem:[#allocation64_spill] sm:$0xff] %v3080_v43 }
  0xad   : > { %1353 = vmatpush1.bf16.msra.mxu0 %v3068_v7  ;;  %1394 = vmatpush1.bf16.msra.mxu1 %v3070_v60  ;;  %v3092_v60 = vld [vmem:[#allocation7 + $0x1e0] ss:$16 sps:$4 sm:$0xff]   ;;  %v3094_v7 = vld [vmem:[#allocation7 + $0x1e8] ss:$16 sps:$4 sm:$0xff]  }
  0xae   : > { %1354 = vmatprep.subr.bf16.mxu0 %v3078_v57  ;;  %1395 = vmatprep.subr.bf16.mxu1 %v3082_v39  ;;  %3548 = vst [vmem:[#allocation68_spill] sm:$0xff] %v3092_v60  ;;  %3549 = vst [vmem:[#allocation69_spill] sm:$0xff] %v3094_v7 }
  0xb1   : > { %1355 = vmatpush1.bf16.msra.mxu0 %v3076_v59  ;;  %1396 = vmatpush1.bf16.msra.mxu1 %v3080_v43 }
  0xb2   : > { %1356 = vmatprep.subr.bf16.mxu0 %v3084_v37  ;;  %1397 = vmatprep.subr.bf16.mxu1 %v3087_v31 }
  0xb5   : > { %1357 = vmatpush1.bf16.msra.mxu0 %v3092_v60  ;;  %1398 = vmatpush1.bf16.msra.mxu1 %v3094_v7 }
 0x12b   : > { %v638_v57 = vpop.f32.mrb[0].mxu0  ;;  %v689_v56 = vpop.f32.mrb[0].mxu1 }
 0x12c   : > { %v639_v39 = vadd.f32 %v638_v57, %v2865_v49  ;;  %v640_v48 = vpop.f32.mrb[1].mxu0  ;;  %v690_v59 = vadd.f32 %v689_v56, %v2908_v1  ;;  %v691_v43 = vpop.f32.mrb[1].mxu1 }
 0x12d   : > { %v641_v17 = vadd.f32 %v640_v48, %v2893_v58  ;;  %v642_v15 = vpop.f32.mrb[2].mxu0  ;;  %v692_v14 = vadd.f32 %v691_v43, %v2912_v2  ;;  %v693_v37 = vpop.f32.mrb[2].mxu1 }
 0x12e   : > { %v643_v31 = vadd.f32 %v642_v15, %v2865_v49  ;;  %v644_v13 = vpop.f32.mrb[3].mxu0  ;;  %v694_v60 = vadd.f32 %v693_v37, %v2908_v1  ;;  %v695_v7 = vpop.f32.mrb[3].mxu1 }
 0x12f   : > { %v645_v12 = vadd.f32 %v644_v13, %v2893_v58  ;;  %v696_v57 = vadd.f32 %v695_v7, %v2912_v2 }
 0x130   : > { %710 = vst [vmem:[#allocation2 + $0x20] sm:$0xff] %v643_v31  ;;  %712 = vst [vmem:[#allocation2 + $0x30] sm:$0xff] %v694_v60 }
 0x131   : > { %711 = vst [vmem:[#allocation2 + $0x28] sm:$0xff] %v645_v12  ;;  %713 = vst [vmem:[#allocation2 + $0x38] sm:$0xff] %v696_v57 }
 0x14b   : > { %v924_v56 = vpop.f32.mrb[8].mxu0  ;;  %v965_v48 = vpop.f32.mrb[8].mxu1 }
 0x14c   : > { %v925_v11 = vadd.f32 %v924_v56, %v639_v39  ;;  %v966_v10 = vadd.f32 %v965_v48, %v690_v59  ;;  %v926_v43 = vpop.f32.mrb[9].mxu0  ;;  %v967_v9 = vpop.f32.mrb[9].mxu1 }
 0x14d   : > { %v927_v8 = vadd.f32 %v926_v43, %v641_v17  ;;  %v968_v49 = vadd.f32 %v967_v9, %v692_v14  ;;  %v928_v15 = vpop.f32.mrb[10].mxu0  ;;  %v969_v6 = vpop.f32.mrb[10].mxu1  ;;  %v719_v14 = vld [vmem:[#allocation3] sm:$0xff] }
 0x14e   : > { %v2086_v1 = vmul.f32 -1.442695, %v925_v11  ;;  %v929_v37 = vpop.f32.mrb[11].mxu0  ;;  %v970_v5 = vpop.f32.mrb[11].mxu1  ;;  %v2088_v7 = vmul.f32 -1.442695, %v966_v10 }
 0x14f   : > { %v2087_v58 = vmul.f32 -1.442695, %v927_v8  ;;  %v500_v15 = vld [vmem:[%s3411_s7] sm:$0xf] }
 0x150   : > { %2402 = vpow2.f32 %v2086_v1  ;;  %v3550_v1 = vsub.s32 0, %v2828_v36 }
 0x151   : > { %2404 = vpow2.f32 %v2087_v58  ;;  %v3551_v58 = vsub.s32 1, %v2828_v36 }
 0x152   : > { %2406 = vtanh.f32 %v968_v49  ;;  %v3116_v37 = vrot.slane %v500_v15, %v3550_v1 }
 0x153   : > { %2408 = vpow2.f32 %v2088_v7  ;;  %v3120_v7 = vrot.slane %v500_v15, %v3551_v58 }
 0x15a   : > { %v2403_v60 = vpop.eup %2402 }
 0x15b   : > { %v981_v2 = vadd.f32 1.0, %v2403_v60  ;;  %v2405_v12 = vpop.eup %2404 }
 0x15c   : > { %v982_v59 = vadd.f32 1.0, %v2405_v12  ;;  %v2407_v13 = vpop.eup %2406 }
 0x15d   : > { %2410 = vrcp.f32 %v981_v2  ;;  %v2409_v17 = vpop.eup %2408 }
 0x15e   : > { %2412 = vrcp.f32 %v982_v59  ;;  %v983_v31 = vadd.f32 1.0, %v2409_v17 }
 0x160   : > { %2414 = vrcp.f32 %v983_v31 }
 0x167   : > { %v2411_v9 = vpop.eup %2410 }
 0x168   : > { %v992_v6 = vmul.f32 %v2411_v9, %v2407_v13  ;;  %v2413_v11 = vpop.eup %2412 }
 0x169   : > { %v991_v5 = vmul.f32 %v2413_v11, %v719_v14 }
 0x16a   : > { %v2415_v10 = vpop.eup %2414 }
 0x16b   : > { %v3108_v8 = vadd.f32 %v992_v6, %v991_v5 }
 0x16d   : > { %2416 = vtanh.f32 %v3108_v8  ;;  %1442 = vst [vmem:[%s3414_s10] sm:$0xff] (!%p2158_p10), %v3108_v8 }
 0x177   : > { %v2417_v39 = vpop.eup %2416 }
 0x178   : > { %v995_v57 = vmul.f32 %v2417_v39, %v2415_v10  ;;  %v3552_v10 = vsub.s32 2, %v2828_v36 }
 0x17a   : > { %v996_v56 = vpack.c.bf16 %v995_v57, %v995_v57  ;;  %v3126_v39 = vrot.slane %v500_v15, %v3552_v10  ;;  %1439 = vst [vmem:[%s3413_s9] sm:$0xff] (!%p2158_p10), %v995_v57 }
 0x17c   : > { %997 = vst [vmem:[#allocation4] sm:$0xf] %v996_v56  ;;  %v3553_v56 = vsub.s32 3, %v2828_v36  ;;  %v721_v36 = vld [vmem:[#allocation3 + $0x8] sm:$0xff] }
 0x183   : > { %v998_v48 = vld [vmem:[#allocation4] sm:$0xff] }
 0x184   : > { %v2090_v43 = vcombine.high %v998_v48, %v998_v48  ;;  %v2089_v49 = vcombine.low %v998_v48, %v998_v48  ;;  %v3130_v48 = vrot.slane %v500_v15, %v3553_v56 }
 0x186   : > { %1358 = vmatprep.mubr.bf16.mxu0 %v2090_v43  ;;  %1399 = vmatprep.mubr.bf16.mxu1 %v2090_v43 }
 0x187   : > { %1359 = vmatmul.mubr.bf16.vlgmr.msra.gmra.mrb[12].mxu0 %v2089_v49  ;;  %1400 = vmatmul.mubr.bf16.vlgmr.msra.gmra.mrb[12].mxu1 %v2089_v49 }
 0x25a   : > { %v1360_v60 = vpop.f32.mrb[12].mxu0  ;;  %v1401_v2 = vpop.f32.mrb[12].mxu1 }
 0x25b   : > { %v1361_v12 = vadd.f32 %v1360_v60, %v3116_v37  ;;  %v1362_v59 = vpop.f32.mrb[13].mxu0  ;;  %v1403_v13 = vpop.f32.mrb[13].mxu1  ;;  %v1402_v43 = vadd.f32 %v1401_v2, %v3126_v39 }
 0x25c   : > { %v1363_v17 = vadd.f32 %v1362_v59, %v3120_v7  ;;  %v1364_v9 = vpop.f32.mrb[14].mxu0  ;;  %v1405_v14 = vpop.f32.mrb[14].mxu1  ;;  %v1404_v49 = vadd.f32 %v1403_v13, %v3130_v48 }
 0x25d   : > { %v2155_v6 = vmul.f32 -1.442695, %v1361_v12  ;;  %v1365_v11 = vpop.f32.mrb[15].mxu0  ;;  %v1406_v31 = vpop.f32.mrb[15].mxu1  ;;  %v2157_v1 = vmul.f32 -1.442695, %v1402_v43 }
 0x25e   : > { %v2156_v5 = vmul.f32 -1.442695, %v1363_v17 }
 0x25f   : > { %2418 = vpow2.f32 %v2155_v6 }
 0x260   : > { %2420 = vpow2.f32 %v2156_v5 }
 0x261   : > { %2422 = vtanh.f32 %v1404_v49 }
 0x262   : > { %2424 = vpow2.f32 %v2157_v1 }
 0x269   : > { %v2419_v58 = vpop.eup %2418 }
 0x26a   : > { %v1417_v60 = vadd.f32 1.0, %v2419_v58  ;;  %v2421_v12 = vpop.eup %2420 }
 0x26b   : > { %v1418_v59 = vadd.f32 1.0, %v2421_v12  ;;  %v2423_v17 = vpop.eup %2422 }
 0x26c   : > { %2426 = vrcp.f32 %v1417_v60  ;;  %v2425_v9 = vpop.eup %2424 }
 0x26d   : > { %2428 = vrcp.f32 %v1418_v59  ;;  %v1419_v11 = vadd.f32 1.0, %v2425_v9 }
 0x26f   : > { %2430 = vrcp.f32 %v1419_v11 }
 0x276   : > { %v2427_v14 = vpop.eup %2426 }
 0x277   : > { %v1428_v15 = vmul.f32 %v2427_v14, %v2423_v17  ;;  %v2429_v6 = vpop.eup %2428 }
 0x278   : > { %v1427_v2 = vmul.f32 %v2429_v6, %v721_v36 }
 0x279   : > { %v2431_v13 = vpop.eup %2430 }
 0x27a   : > { %v3134_v31 = vadd.f32 %v1428_v15, %v1427_v2 }
 0x27c   : > { %2432 = vtanh.f32 %v3134_v31  ;;  %2160 = vst [vmem:[%s3414_s10 + $0x8] sm:$0xff] (!%p2158_p10), %v3134_v31 }
 0x285   : > { %1438 = sbr.rel (%p2158_p10) target bundleno = 652 (0x28c), region = 68 }
 0x286   : > { %v2433_v5 = vpop.eup %2432 }
 0x287   : > { %v1431_v10 = vmul.f32 %v2433_v5, %v2431_v13 }
 0x289   : > { %v1432_v56 = vpack.c.bf16 %v1431_v10, %v1431_v10  ;;  %1434 = vst [vmem:[%s2730_s15] sm:$0xff] %v1431_v10  ;;  %2159 = vst [vmem:[%s3413_s9 + $0x8] sm:$0xff] (!%p2158_p10), %v1431_v10 }
 0x28b   : > { %1433 = vst [vmem:[#allocation4 + $0x4] sm:$0xf] %v1432_v56 }
 0x28c PF: > { %1453 = vmatprep.subr.bf16.mxu0 %v2776_v18  ;;  %1494 = vmatprep.subr.bf16.mxu1 %v2780_v20  ;;  %v3554_v57 = vmov 0   ;;  %v1445_v43 = vld [vmem:[#allocation4] sm:$0xf]  ;;  %v3555_v49 = vld [vmem:[#allocation12_spill] sm:$0xff]  ;;  %v3556_v1 = vld [vmem:[#allocation13_spill] sm:$0xff]  ;;  %s1679_s23 = sadd.s32 1, %s2718_s20 }
 0x28d   : > { %1454 = vmatpush1.bf16.msra.mxu0 %v2774_v16  ;;  %1495 = vmatpush1.bf16.msra.mxu1 %v2778_v19  ;;  %v3557_v58 = vld [vmem:[#allocation14_spill] sm:$0xff]  ;;  %v3558_v60 = vld [vmem:[#allocation15_spill] sm:$0xff]  ;;  %v3559_v12 = vld [vmem:[#allocation16_spill] sm:$0xff]  ;;  %p2170_p11 = scmp.ne.s32.totalorder %s1679_s23, 7 }
 0x28e   : > { %1455 = vmatprep.subr.bf16.mxu0 %v2783_v21  ;;  %1496 = vmatprep.subr.bf16.mxu1 %v2788_v22  ;;  %v3560_v59 = vld [vmem:[#allocation17_spill] sm:$0xff]  ;;  %v3561_v17 = vld [vmem:[#allocation18_spill] sm:$0xff]  ;;  %v3562_v9 = vld [vmem:[#allocation19_spill] sm:$0xff] }
 0x28f   : > { %1485 = vmatprep.mubr.bf16.mxu0 %v3554_v57  ;;  %1526 = vmatprep.mubr.bf16.mxu1 %v3554_v57  ;;  %v3563_v14 = vld [vmem:[#allocation20_spill] sm:$0xff]  ;;  %v3564_v36 = vld [vmem:[#allocation21_spill] sm:$0xff]  ;;  %v3565_v15 = vld [vmem:[#allocation22_spill] sm:$0xff] }
 0x290   : > { %v3566_v6 = vld [vmem:[#allocation23_spill] sm:$0xff]  ;;  %v3567_v11 = vld [vmem:[#allocation24_spill] sm:$0xff]  ;;  %v3568_v2 = vld [vmem:[#allocation25_spill] sm:$0xff] }
 0x291   : > { %1456 = vmatpush1.bf16.msra.mxu0 %v2792_v23  ;;  %1497 = vmatpush1.bf16.msra.mxu1 %v2794_v24  ;;  %v3569_v13 = vld [vmem:[#allocation26_spill] sm:$0xff]  ;;  %v3570_v5 = vld [vmem:[#allocation27_spill] sm:$0xff]  ;;  %v3571_v10 = vld [vmem:[#allocation28_spill] sm:$0xff] }
 0x292   : > { %1457 = vmatprep.subr.bf16.mxu0 %v2798_v25  ;;  %1498 = vmatprep.subr.bf16.mxu1 %v2800_v26  ;;  %v3572_v56 = vld [vmem:[#allocation29_spill] sm:$0xff]  ;;  %v3573_v57 = vld [vmem:[#allocation30_spill] sm:$0xff] }
 0x295   : > { %1458 = vmatpush1.bf16.msra.mxu0 %v2806_v27  ;;  %1499 = vmatpush1.bf16.msra.mxu1 %v2808_v28 }
 0x296   : > { %1459 = vmatprep.subr.bf16.mxu0 %v2812_v29  ;;  %1500 = vmatprep.subr.bf16.mxu1 %v2814_v30 }
 0x299   : > { %1460 = vmatpush1.bf16.msra.mxu0 %v2818_v32  ;;  %1501 = vmatpush1.bf16.msra.mxu1 %v2820_v33 }
 0x29a   : > { %1461 = vmatprep.subr.bf16.mxu0 %v2824_v34  ;;  %1502 = vmatprep.subr.bf16.mxu1 %v2826_v35 }
 0x29d   : > { %1462 = vmatpush1.bf16.msra.mxu0 %v2831_v38  ;;  %1503 = vmatpush1.bf16.msra.mxu1 %v2835_v40 }
 0x29e   : > { %1463 = vmatprep.subr.bf16.mxu0 %v2837_v41  ;;  %1504 = vmatprep.subr.bf16.mxu1 %v2841_v42 }
 0x2a1   : > { %1464 = vmatpush1.bf16.msra.mxu0 %v2844_v44  ;;  %1505 = vmatpush1.bf16.msra.mxu1 %v2848_v45 }
 0x2a2   : > { %1465 = vmatprep.subr.bf16.mxu0 %v2850_v46  ;;  %1506 = vmatprep.subr.bf16.mxu1 %v2852_v47 }
 0x2a5   : > { %1466 = vmatpush1.bf16.msra.mxu0 %v2867_v50  ;;  %1507 = vmatpush1.bf16.msra.mxu1 %v2869_v51 }
 0x2a6   : > { %1467 = vmatprep.subr.bf16.mxu0 %v2871_v52  ;;  %1508 = vmatprep.subr.bf16.mxu1 %v2873_v53 }
 0x2a9   : > { %1468 = vmatpush1.bf16.msra.mxu0 %v2880_v54  ;;  %1509 = vmatpush1.bf16.msra.mxu1 %v2882_v55 }
 0x2aa   : > { %1569 = vmatprep.subr.bf16.mxu0 %v2900_v62  ;;  %1610 = vmatprep.subr.bf16.mxu1 %v2904_v0 }
 0x2ac   : > { %1486 = vmatmul.mubr.bf16.vlgmr.msra.gmra.mrb[16].mxu0 %v1445_v43  ;;  %1527 = vmatmul.mubr.bf16.vlgmr.msra.gmra.mrb[16].mxu1 %v1445_v43  ;;  %v3574_v43 = vld [vmem:[#allocation31_spill] sm:$0xff] }
 0x2ad   : > { %1570 = vmatpush1.bf16.msra.mxu0 %v2898_v61  ;;  %1611 = vmatpush1.bf16.msra.mxu1 %v2902_v63 }
 0x2ae   : > { %1571 = vmatprep.subr.bf16.mxu0 %v2920_v3  ;;  %1612 = vmatprep.subr.bf16.mxu1 %v2922_v4 }
 0x2b1   : > { %1572 = vmatpush1.bf16.msra.mxu0 %v3555_v49  ;;  %1613 = vmatpush1.bf16.msra.mxu1 %v3556_v1  ;;  %v3575_v49 = vld [vmem:[#allocation32_spill] sm:$0xff]  ;;  %v3576_v1 = vld [vmem:[#allocation33_spill] sm:$0xff] }
 0x2b2   : > { %1573 = vmatprep.subr.bf16.mxu0 %v3557_v58  ;;  %1614 = vmatprep.subr.bf16.mxu1 %v3558_v60  ;;  %v3577_v58 = vld [vmem:[#allocation34_spill] sm:$0xff]  ;;  %v3578_v60 = vld [vmem:[#allocation35_spill] sm:$0xff] }
 0x2b5   : > { %1574 = vmatpush1.bf16.msra.mxu0 %v3559_v12  ;;  %1615 = vmatpush1.bf16.msra.mxu1 %v3560_v59  ;;  %v3579_v12 = vld [vmem:[#allocation36_spill] sm:$0xff]  ;;  %v3580_v59 = vld [vmem:[#allocation37_spill] sm:$0xff] }
 0x2b6   : > { %1575 = vmatprep.subr.bf16.mxu0 %v3561_v17  ;;  %1616 = vmatprep.subr.bf16.mxu1 %v3562_v9  ;;  %v3581_v17 = vld [vmem:[#allocation38_spill] sm:$0xff]  ;;  %v3582_v9 = vld [vmem:[#allocation39_spill] sm:$0xff] }
 0x2b9   : > { %1576 = vmatpush1.bf16.msra.mxu0 %v3563_v14  ;;  %1617 = vmatpush1.bf16.msra.mxu1 %v3564_v36  ;;  %v3583_v14 = vld [vmem:[#allocation40_spill] sm:$0xff]  ;;  %v3584_v36 = vld [vmem:[#allocation41_spill] sm:$0xff] }
 0x2ba   : > { %1577 = vmatprep.subr.bf16.mxu0 %v3565_v15  ;;  %1618 = vmatprep.subr.bf16.mxu1 %v3566_v6  ;;  %v3585_v15 = vld [vmem:[#allocation42_spill] sm:$0xff]  ;;  %v3586_v6 = vld [vmem:[#allocation43_spill] sm:$0xff] }
 0x2bd   : > { %1578 = vmatpush1.bf16.msra.mxu0 %v3567_v11  ;;  %1619 = vmatpush1.bf16.msra.mxu1 %v3568_v2  ;;  %v3587_v11 = vld [vmem:[#allocation44_spill] sm:$0xff]  ;;  %v3588_v2 = vld [vmem:[#allocation45_spill] sm:$0xff] }
 0x2be   : > { %1579 = vmatprep.subr.bf16.mxu0 %v3569_v13  ;;  %1620 = vmatprep.subr.bf16.mxu1 %v3570_v5  ;;  %v3589_v13 = vld [vmem:[#allocation46_spill] sm:$0xff]  ;;  %v3590_v5 = vld [vmem:[#allocation47_spill] sm:$0xff] }
 0x2c1   : > { %1580 = vmatpush1.bf16.msra.mxu0 %v3571_v10  ;;  %1621 = vmatpush1.bf16.msra.mxu1 %v3572_v56  ;;  %v3591_v10 = vld [vmem:[#allocation48_spill] sm:$0xff]  ;;  %v3592_v56 = vld [vmem:[#allocation49_spill] sm:$0xff] }
 0x2c2   : > { %1581 = vmatprep.subr.bf16.mxu0 %v3573_v57  ;;  %1622 = vmatprep.subr.bf16.mxu1 %v3574_v43  ;;  %v3593_v57 = vld [vmem:[#allocation50_spill] sm:$0xff]  ;;  %v3594_v43 = vld [vmem:[#allocation51_spill] sm:$0xff] }
 0x2c5   : > { %1582 = vmatpush1.bf16.msra.mxu0 %v3575_v49  ;;  %1623 = vmatpush1.bf16.msra.mxu1 %v3576_v1  ;;  %v3595_v49 = vld [vmem:[#allocation52_spill] sm:$0xff]  ;;  %v3596_v1 = vld [vmem:[#allocation53_spill] sm:$0xff] }
 0x2c6   : > { %1583 = vmatprep.subr.bf16.mxu0 %v3577_v58  ;;  %1624 = vmatprep.subr.bf16.mxu1 %v3578_v60  ;;  %v3597_v58 = vld [vmem:[#allocation54_spill] sm:$0xff]  ;;  %v3598_v60 = vld [vmem:[#allocation55_spill] sm:$0xff] }
 0x2c9   : > { %1584 = vmatpush1.bf16.msra.mxu0 %v3579_v12  ;;  %1625 = vmatpush1.bf16.msra.mxu1 %v3580_v59  ;;  %v3599_v12 = vld [vmem:[#allocation56_spill] sm:$0xff]  ;;  %v3600_v59 = vld [vmem:[#allocation57_spill] sm:$0xff] }
 0x2ca   : > { %1585 = vmatprep.subr.bf16.mxu0 %v3581_v17  ;;  %1626 = vmatprep.subr.bf16.mxu1 %v3582_v9  ;;  %v3601_v17 = vld [vmem:[#allocation58_spill] sm:$0xff]  ;;  %v3602_v9 = vld [vmem:[#allocation59_spill] sm:$0xff] }
 0x2cd   : > { %1586 = vmatpush1.bf16.msra.mxu0 %v3583_v14  ;;  %1627 = vmatpush1.bf16.msra.mxu1 %v3584_v36  ;;  %v3603_v14 = vld [vmem:[#allocation60_spill] sm:$0xff]  ;;  %v3604_v36 = vld [vmem:[#allocation61_spill] sm:$0xff] }
 0x2ce   : > { %1587 = vmatprep.subr.bf16.mxu0 %v3585_v15  ;;  %1628 = vmatprep.subr.bf16.mxu1 %v3586_v6  ;;  %v3605_v15 = vld [vmem:[#allocation63_spill] sm:$0xff]  ;;  %v3606_v6 = vld [vmem:[#allocation65_spill] sm:$0xff] }
 0x2d1   : > { %1588 = vmatpush1.bf16.msra.mxu0 %v3587_v11  ;;  %1629 = vmatpush1.bf16.msra.mxu1 %v3588_v2  ;;  %v3607_v11 = vld [vmem:[#allocation62_spill] sm:$0xff]  ;;  %v3608_v2 = vld [vmem:[#allocation64_spill] sm:$0xff] }
 0x2d2   : > { %1589 = vmatprep.subr.bf16.mxu0 %v3589_v13  ;;  %1630 = vmatprep.subr.bf16.mxu1 %v3590_v5  ;;  %v3609_v13 = vld [vmem:[#allocation66_spill] sm:$0xff]  ;;  %v3610_v5 = vld [vmem:[#allocation67_spill] sm:$0xff] }
 0x2d5   : > { %1590 = vmatpush1.bf16.msra.mxu0 %v3591_v10  ;;  %1631 = vmatpush1.bf16.msra.mxu1 %v3592_v56  ;;  %v3611_v10 = vld [vmem:[#allocation68_spill] sm:$0xff]  ;;  %v3612_v56 = vld [vmem:[#allocation69_spill] sm:$0xff] }
 0x2d6   : > { %1591 = vmatprep.subr.bf16.mxu0 %v3593_v57  ;;  %1632 = vmatprep.subr.bf16.mxu1 %v3594_v43  ;;  %v1449_v57 = vld [vmem:[#allocation2 + $0x20] sm:$0xff]  ;;  %v1450_v43 = vld [vmem:[#allocation2 + $0x28] sm:$0xff] }
 0x2d9   : > { %1592 = vmatpush1.bf16.msra.mxu0 %v3595_v49  ;;  %1633 = vmatpush1.bf16.msra.mxu1 %v3596_v1 }
 0x2da   : > { %1593 = vmatprep.subr.bf16.mxu0 %v3597_v58  ;;  %1634 = vmatprep.subr.bf16.mxu1 %v3598_v60 }
 0x2dd   : > { %1594 = vmatpush1.bf16.msra.mxu0 %v3599_v12  ;;  %1635 = vmatpush1.bf16.msra.mxu1 %v3600_v59 }
 0x2de   : > { %1595 = vmatprep.subr.bf16.mxu0 %v3601_v17  ;;  %1636 = vmatprep.subr.bf16.mxu1 %v3602_v9 }
 0x2e1   : > { %1596 = vmatpush1.bf16.msra.mxu0 %v3603_v14  ;;  %1637 = vmatpush1.bf16.msra.mxu1 %v3604_v36 }
 0x2e2   : > { %1597 = vmatprep.subr.bf16.mxu0 %v3605_v15  ;;  %1638 = vmatprep.subr.bf16.mxu1 %v3606_v6 }
 0x2e5   : > { %1598 = vmatpush1.bf16.msra.mxu0 %v3607_v11  ;;  %1639 = vmatpush1.bf16.msra.mxu1 %v3608_v2  ;;  %v1451_v11 = vld [vmem:[#allocation2 + $0x30] sm:$0xff] }
 0x2e6   : > { %1599 = vmatprep.subr.bf16.mxu0 %v3609_v13  ;;  %1640 = vmatprep.subr.bf16.mxu1 %v3610_v5  ;;  %v1452_v13 = vld [vmem:[#allocation2 + $0x38] sm:$0xff] }
 0x2e9   : > { %1600 = vmatpush1.bf16.msra.mxu0 %v3611_v10  ;;  %1641 = vmatpush1.bf16.msra.mxu1 %v3612_v56 }
 0x37f   : > { %v1487_v49 = vpop.f32.mrb[16].mxu0  ;;  %v1528_v1 = vpop.f32.mrb[16].mxu1 }
 0x380   : > { %v1488_v58 = vadd.f32 %v1487_v49, %v1449_v57  ;;  %v1489_v60 = vpop.f32.mrb[17].mxu0  ;;  %v1530_v12 = vpop.f32.mrb[17].mxu1  ;;  %v1529_v2 = vadd.f32 %v1528_v1, %v1451_v11 }
 0x381   : > { %v1490_v59 = vadd.f32 %v1489_v60, %v1450_v43  ;;  %v1491_v17 = vpop.f32.mrb[18].mxu0  ;;  %v1532_v9 = vpop.f32.mrb[18].mxu1  ;;  %v1531_v10 = vadd.f32 %v1530_v12, %v1452_v13 }
 0x382   : > { %v2161_v14 = vmul.f32 -1.442695, %v1488_v58  ;;  %v1492_v36 = vpop.f32.mrb[19].mxu0  ;;  %v1533_v15 = vpop.f32.mrb[19].mxu1  ;;  %v2163_v5 = vmul.f32 -1.442695, %v1529_v2 }
 0x383   : > { %v2162_v6 = vmul.f32 -1.442695, %v1490_v59 }
 0x384   : > { %2436 = vpow2.f32 %v2161_v14 }
 0x385   : > { %2438 = vpow2.f32 %v2162_v6 }
 0x386   : > { %2440 = vpow2.f32 %v2163_v5 }
 0x387   : > { %2442 = vtanh.f32 %v1531_v10 }
 0x38e   : > { %v2437_v56 = vpop.eup %2436 }
 0x38f   : > { %v2439_v4 = vpop.eup %2438  ;;  %v1544_v57 = vadd.f32 1.0, %v2437_v56 }
 0x390   : > { %v1545_v49 = vadd.f32 1.0, %v2439_v4  ;;  %v2441_v43 = vpop.eup %2440 }
 0x391   : > { %2444 = vrcp.f32 %v1544_v57  ;;  %v2443_v58 = vpop.eup %2442  ;;  %v1546_v17 = vadd.f32 1.0, %v2441_v43 }
 0x392   : > { %2446 = vrcp.f32 %v1545_v49 }
 0x393   : > { %2448 = vrcp.f32 %v1546_v17 }
 0x39b   : > { %v2445_v60 = vpop.eup %2444 }
 0x39c   : > { %v2447_v59 = vpop.eup %2446  ;;  %v1555_v9 = vmul.f32 %v2445_v60, %v2443_v58 }
 0x39d   : > { %v1554_v14 = vmul.f32 %v2447_v59, %v3108_v8  ;;  %v2449_v12 = vpop.eup %2448 }
 0x39f   : > { %v3252_v1 = vadd.f32 %v1555_v9, %v1554_v14 }
 0x3a1   : > { %2450 = vtanh.f32 %v3252_v1  ;;  %1687 = vst [vmem:[%s3414_s10] sm:$0xff] (!%p2170_p11), %v3252_v1 }
 0x3ab   : > { %v2451_v36 = vpop.eup %2450 }
 0x3ac   : > { %v1558_v15 = vmul.f32 %v2451_v36, %v2449_v12 }
 0x3ae   : > { %v1559_v4 = vpack.c.bf16 %v1558_v15, %v1558_v15  ;;  %1684 = vst [vmem:[%s3413_s9] sm:$0xff] (!%p2170_p11), %v1558_v15 }
 0x3b0   : > { %1560 = vst [vmem:[#allocation4] sm:$0xf] %v1559_v4 }
 0x3b7   : > { %v1561_v6 = vld [vmem:[#allocation4] sm:$0xff] }
 0x3b8   : > { %v2165_v11 = vcombine.high %v1561_v6, %v1561_v6  ;;  %v2164_v2 = vcombine.low %v1561_v6, %v1561_v6 }
 0x3ba   : > { %1601 = vmatprep.mubr.bf16.mxu0 %v2165_v11  ;;  %1642 = vmatprep.mubr.bf16.mxu1 %v2165_v11 }
 0x3bb   : > { %1602 = vmatmul.mubr.bf16.vlgmr.msra.gmra.mrb[20].mxu0 %v2164_v2  ;;  %1643 = vmatmul.mubr.bf16.vlgmr.msra.gmra.mrb[20].mxu1 %v2164_v2 }
 0x48e   : > { %v1603_v8 = vpop.f32.mrb[20].mxu0  ;;  %v1644_v13 = vpop.f32.mrb[20].mxu1 }
 0x48f   : > { %v1604_v5 = vadd.f32 %v1603_v8, %v3116_v37  ;;  %v1605_v10 = vpop.f32.mrb[21].mxu0  ;;  %v1646_v56 = vpop.f32.mrb[21].mxu1  ;;  %v1645_v9 = vadd.f32 %v1644_v13, %v3126_v39 }
 0x490   : > { %v1606_v57 = vadd.f32 %v1605_v10, %v3120_v7  ;;  %v1607_v49 = vpop.f32.mrb[22].mxu0  ;;  %v1648_v43 = vpop.f32.mrb[22].mxu1  ;;  %v1647_v14 = vadd.f32 %v1646_v56, %v3130_v48 }
 0x491   : > { %v2166_v58 = vmul.f32 -1.442695, %v1604_v5  ;;  %v1608_v60 = vpop.f32.mrb[23].mxu0  ;;  %v1649_v17 = vpop.f32.mrb[23].mxu1  ;;  %v2168_v12 = vmul.f32 -1.442695, %v1645_v9 }
 0x492   : > { %v2167_v59 = vmul.f32 -1.442695, %v1606_v57 }
 0x493   : > { %2452 = vpow2.f32 %v2166_v58 }
 0x494   : > { %2454 = vpow2.f32 %v2167_v59 }
 0x495   : > { %2456 = vtanh.f32 %v1647_v14 }
 0x496   : > { %2458 = vpow2.f32 %v2168_v12 }
 0x49d   : > { %v2453_v36 = vpop.eup %2452 }
 0x49e   : > { %v1660_v4 = vadd.f32 1.0, %v2453_v36  ;;  %v2455_v6 = vpop.eup %2454 }
 0x49f   : > { %v1661_v11 = vadd.f32 1.0, %v2455_v6  ;;  %v2457_v2 = vpop.eup %2456 }
 0x4a0   : > { %2460 = vrcp.f32 %v1660_v4  ;;  %v2459_v8 = vpop.eup %2458 }
 0x4a1   : > { %2462 = vrcp.f32 %v1661_v11  ;;  %v1662_v49 = vadd.f32 1.0, %v2459_v8 }
 0x4a3   : > { %2464 = vrcp.f32 %v1662_v49 }
 0x4aa   : > { %v2461_v5 = vpop.eup %2460 }
 0x4ab   : > { %v1671_v10 = vmul.f32 %v2461_v5, %v2457_v2  ;;  %v2463_v57 = vpop.eup %2462 }
 0x4ac   : > { %v1670_v13 = vmul.f32 %v2463_v57, %v3134_v31 }
 0x4ad   : > { %v2465_v56 = vpop.eup %2464 }
 0x4ae   : > { %v3261_v43 = vadd.f32 %v1671_v10, %v1670_v13 }
 0x4b0   : > { %2466 = vtanh.f32 %v3261_v43  ;;  %2172 = vst [vmem:[%s3414_s10 + $0x8] sm:$0xff] (!%p2170_p11), %v3261_v43 }
 0x4b9   : > { %1683 = sbr.rel (%p2170_p11) target bundleno = 1216 (0x4c0), region = 72 }
 0x4ba   : > { %v2467_v58 = vpop.eup %2466 }
 0x4bb   : > { %v1674_v60 = vmul.f32 %v2467_v58, %v2465_v56 }
 0x4bd   : > { %v1675_v17 = vpack.c.bf16 %v1674_v60, %v1674_v60  ;;  %2169 = vst [vmem:[%s2730_s15 + $0x8] sm:$0xff] %v1674_v60  ;;  %2171 = vst [vmem:[%s3413_s9 + $0x8] sm:$0xff] (!%p2170_p11), %v1674_v60 }
 0x4bf   : > { %1676 = vst [vmem:[#allocation4 + $0x4] sm:$0xf] %v1675_v17 }
 0x4c0 PF: > { %1698 = vmatprep.subr.bf16.mxu0 %v2776_v18  ;;  %1739 = vmatprep.subr.bf16.mxu1 %v2780_v20  ;;  %v3613_v31 = vmov 0   ;;  %v3614_v18 = vld [vmem:[#allocation11_spill] sm:$0xff]  ;;  %v3616_v20 = vld [vmem:[#allocation13_spill] sm:$0xff]  ;;  %v3651_v59 = vld [vmem:[#allocation48_spill] sm:$0xff]  ;;  %s1924_s19 = sadd.s32 2, %s2718_s20 }
 0x4c1   : > { %1699 = vmatpush1.bf16.msra.mxu0 %v2774_v16  ;;  %1740 = vmatpush1.bf16.msra.mxu1 %v2778_v19  ;;  %v1690_v16 = vld [vmem:[#allocation4] sm:$0xf]  ;;  %v3615_v19 = vld [vmem:[#allocation12_spill] sm:$0xff]  ;;  %v3650_v15 = vld [vmem:[#allocation47_spill] sm:$0xff]  ;;  %p2182_p12 = scmp.ne.s32.totalorder %s1924_s19, 7 }
 0x4c2   : > { %1700 = vmatprep.subr.bf16.mxu0 %v2783_v21  ;;  %1741 = vmatprep.subr.bf16.mxu1 %v2788_v22  ;;  %v3617_v21 = vld [vmem:[#allocation14_spill] sm:$0xff]  ;;  %v3618_v22 = vld [vmem:[#allocation15_spill] sm:$0xff]  ;;  %v3652_v9 = vld [vmem:[#allocation49_spill] sm:$0xff] }
 0x4c3   : > { %1730 = vmatprep.mubr.bf16.mxu0 %v3613_v31  ;;  %1771 = vmatprep.mubr.bf16.mxu1 %v3613_v31  ;;  %v3653_v14 = vld [vmem:[#allocation50_spill] sm:$0xff]  ;;  %v3654_v12 = vld [vmem:[#allocation51_spill] sm:$0xff]  ;;  %v3655_v36 = vld [vmem:[#allocation52_spill] sm:$0xff] }
 0x4c4   : > { %v3656_v4 = vld [vmem:[#allocation53_spill] sm:$0xff]  ;;  %v3657_v6 = vld [vmem:[#allocation54_spill] sm:$0xff]  ;;  %v3658_v11 = vld [vmem:[#allocation55_spill] sm:$0xff] }
 0x4c5   : > { %1701 = vmatpush1.bf16.msra.mxu0 %v2792_v23  ;;  %1742 = vmatpush1.bf16.msra.mxu1 %v2794_v24  ;;  %v3619_v23 = vld [vmem:[#allocation16_spill] sm:$0xff]  ;;  %v3620_v24 = vld [vmem:[#allocation17_spill] sm:$0xff]  ;;  %v3661_v5 = vld [vmem:[#allocation58_spill] sm:$0xff] }
 0x4c6   : > { %1702 = vmatprep.subr.bf16.mxu0 %v2798_v25  ;;  %1743 = vmatprep.subr.bf16.mxu1 %v2800_v26  ;;  %v3621_v25 = vld [vmem:[#allocation18_spill] sm:$0xff]  ;;  %v3622_v26 = vld [vmem:[#allocation19_spill] sm:$0xff]  ;;  %v3659_v2 = vld [vmem:[#allocation56_spill] sm:$0xff] }
 0x4c7   : > { %v3660_v8 = vld [vmem:[#allocation57_spill] sm:$0xff]  ;;  %v3662_v10 = vld [vmem:[#allocation59_spill] sm:$0xff]  ;;  %v3663_v57 = vld [vmem:[#allocation60_spill] sm:$0xff] }
 0x4c8   : > { %v3664_v49 = vld [vmem:[#allocation61_spill] sm:$0xff]  ;;  %v3665_v13 = vld [vmem:[#allocation63_spill] sm:$0xff]  ;;  %v3667_v58 = vld [vmem:[#allocation62_spill] sm:$0xff] }
 0x4c9   : > { %1703 = vmatpush1.bf16.msra.mxu0 %v2806_v27  ;;  %1744 = vmatpush1.bf16.msra.mxu1 %v2808_v28  ;;  %v3623_v27 = vld [vmem:[#allocation20_spill] sm:$0xff]  ;;  %v3624_v28 = vld [vmem:[#allocation21_spill] sm:$0xff]  ;;  %v3669_v17 = vld [vmem:[#allocation66_spill] sm:$0xff] }
 0x4ca   : > { %1704 = vmatprep.subr.bf16.mxu0 %v2812_v29  ;;  %1745 = vmatprep.subr.bf16.mxu1 %v2814_v30  ;;  %v3625_v29 = vld [vmem:[#allocation22_spill] sm:$0xff]  ;;  %v3626_v30 = vld [vmem:[#allocation23_spill] sm:$0xff]  ;;  %v3666_v56 = vld [vmem:[#allocation65_spill] sm:$0xff] }
 0x4cb   : > { %v3668_v60 = vld [vmem:[#allocation64_spill] sm:$0xff]  ;;  %v3670_v31 = vld [vmem:[#allocation67_spill] sm:$0xff] }
 0x4cd   : > { %1705 = vmatpush1.bf16.msra.mxu0 %v2818_v32  ;;  %1746 = vmatpush1.bf16.msra.mxu1 %v2820_v33  ;;  %v3627_v32 = vld [vmem:[#allocation24_spill] sm:$0xff]  ;;  %v3628_v33 = vld [vmem:[#allocation25_spill] sm:$0xff] }
 0x4ce   : > { %1706 = vmatprep.subr.bf16.mxu0 %v2824_v34  ;;  %1747 = vmatprep.subr.bf16.mxu1 %v2826_v35  ;;  %v3629_v34 = vld [vmem:[#allocation26_spill] sm:$0xff]  ;;  %v3630_v35 = vld [vmem:[#allocation27_spill] sm:$0xff] }
 0x4d1   : > { %1707 = vmatpush1.bf16.msra.mxu0 %v2831_v38  ;;  %1748 = vmatpush1.bf16.msra.mxu1 %v2835_v40  ;;  %v3631_v38 = vld [vmem:[#allocation28_spill] sm:$0xff]  ;;  %v3632_v40 = vld [vmem:[#allocation29_spill] sm:$0xff] }
 0x4d2   : > { %1708 = vmatprep.subr.bf16.mxu0 %v2837_v41  ;;  %1749 = vmatprep.subr.bf16.mxu1 %v2841_v42  ;;  %v3633_v41 = vld [vmem:[#allocation30_spill] sm:$0xff]  ;;  %v3634_v42 = vld [vmem:[#allocation31_spill] sm:$0xff] }
 0x4d5   : > { %1709 = vmatpush1.bf16.msra.mxu0 %v2844_v44  ;;  %1750 = vmatpush1.bf16.msra.mxu1 %v2848_v45  ;;  %v3635_v44 = vld [vmem:[#allocation32_spill] sm:$0xff]  ;;  %v3636_v45 = vld [vmem:[#allocation33_spill] sm:$0xff] }
 0x4d6   : > { %1710 = vmatprep.subr.bf16.mxu0 %v2850_v46  ;;  %1751 = vmatprep.subr.bf16.mxu1 %v2852_v47  ;;  %v3637_v46 = vld [vmem:[#allocation34_spill] sm:$0xff]  ;;  %v3638_v47 = vld [vmem:[#allocation35_spill] sm:$0xff] }
 0x4d9   : > { %1711 = vmatpush1.bf16.msra.mxu0 %v2867_v50  ;;  %1752 = vmatpush1.bf16.msra.mxu1 %v2869_v51  ;;  %v3639_v50 = vld [vmem:[#allocation36_spill] sm:$0xff]  ;;  %v3640_v51 = vld [vmem:[#allocation37_spill] sm:$0xff] }
 0x4da   : > { %1712 = vmatprep.subr.bf16.mxu0 %v2871_v52  ;;  %1753 = vmatprep.subr.bf16.mxu1 %v2873_v53  ;;  %v3641_v52 = vld [vmem:[#allocation38_spill] sm:$0xff]  ;;  %v3642_v53 = vld [vmem:[#allocation39_spill] sm:$0xff] }
 0x4dd   : > { %1713 = vmatpush1.bf16.msra.mxu0 %v2880_v54  ;;  %1754 = vmatpush1.bf16.msra.mxu1 %v2882_v55  ;;  %v3643_v54 = vld [vmem:[#allocation40_spill] sm:$0xff]  ;;  %v3644_v55 = vld [vmem:[#allocation41_spill] sm:$0xff] }
 0x4de   : > { %1814 = vmatprep.subr.bf16.mxu0 %v2900_v62  ;;  %1855 = vmatprep.subr.bf16.mxu1 %v2904_v0  ;;  %v3646_v62 = vld [vmem:[#allocation43_spill] sm:$0xff]  ;;  %v3648_v0 = vld [vmem:[#allocation45_spill] sm:$0xff] }
 0x4e0   : > { %1731 = vmatmul.mubr.bf16.vlgmr.msra.gmra.mrb[4].mxu0 %v1690_v16  ;;  %1772 = vmatmul.mubr.bf16.vlgmr.msra.gmra.mrb[4].mxu1 %v1690_v16  ;;  %v3671_v16 = vld [vmem:[#allocation68_spill] sm:$0xff] }
 0x4e1   : > { %1815 = vmatpush1.bf16.msra.mxu0 %v2898_v61  ;;  %1856 = vmatpush1.bf16.msra.mxu1 %v2902_v63  ;;  %v3645_v61 = vld [vmem:[#allocation42_spill] sm:$0xff]  ;;  %v3647_v63 = vld [vmem:[#allocation44_spill] sm:$0xff] }
 0x4e2   : > { %1816 = vmatprep.subr.bf16.mxu0 %v2920_v3  ;;  %1857 = vmatprep.subr.bf16.mxu1 %v3614_v18  ;;  %v3649_v3 = vld [vmem:[#allocation46_spill] sm:$0xff]  ;;  %v3672_v18 = vld [vmem:[#allocation69_spill] sm:$0xff] }
 0x4e5   : > { %1817 = vmatpush1.bf16.msra.mxu0 %v3615_v19  ;;  %1858 = vmatpush1.bf16.msra.mxu1 %v3616_v20  ;;  %v2193_v19 = vld [vmem:[#allocation2 + $0x40] sm:$0xff]  ;;  %v2196_v20 = vld [vmem:[#allocation2 + $0x48] sm:$0xff] }
 0x4e6   : > { %1818 = vmatprep.subr.bf16.mxu0 %v3617_v21  ;;  %1859 = vmatprep.subr.bf16.mxu1 %v3618_v22 }
 0x4e9   : > { %1819 = vmatpush1.bf16.msra.mxu0 %v3619_v23  ;;  %1860 = vmatpush1.bf16.msra.mxu1 %v3620_v24 }
 0x4ea   : > { %1820 = vmatprep.subr.bf16.mxu0 %v3621_v25  ;;  %1861 = vmatprep.subr.bf16.mxu1 %v3622_v26 }
 0x4ed   : > { %1821 = vmatpush1.bf16.msra.mxu0 %v3623_v27  ;;  %1862 = vmatpush1.bf16.msra.mxu1 %v3624_v28 }
 0x4ee   : > { %1822 = vmatprep.subr.bf16.mxu0 %v3625_v29  ;;  %1863 = vmatprep.subr.bf16.mxu1 %v3626_v30 }
 0x4f1   : > { %1823 = vmatpush1.bf16.msra.mxu0 %v3627_v32  ;;  %1864 = vmatpush1.bf16.msra.mxu1 %v3628_v33 }
 0x4f2   : > { %1824 = vmatprep.subr.bf16.mxu0 %v3629_v34  ;;  %1865 = vmatprep.subr.bf16.mxu1 %v3630_v35  ;;  %v2199_v34 = vld [vmem:[#allocation2 + $0x50] sm:$0xff] }
 0x4f5   : > { %1825 = vmatpush1.bf16.msra.mxu0 %v3631_v38  ;;  %1866 = vmatpush1.bf16.msra.mxu1 %v3632_v40  ;;  %v2202_v38 = vld [vmem:[#allocation2 + $0x58] sm:$0xff] }
 0x4f6   : > { %1826 = vmatprep.subr.bf16.mxu0 %v3633_v41  ;;  %1867 = vmatprep.subr.bf16.mxu1 %v3634_v42 }
 0x4f9   : > { %1827 = vmatpush1.bf16.msra.mxu0 %v3635_v44  ;;  %1868 = vmatpush1.bf16.msra.mxu1 %v3636_v45 }
 0x4fa   : > { %1828 = vmatprep.subr.bf16.mxu0 %v3637_v46  ;;  %1869 = vmatprep.subr.bf16.mxu1 %v3638_v47 }
 0x4fd   : > { %1829 = vmatpush1.bf16.msra.mxu0 %v3639_v50  ;;  %1870 = vmatpush1.bf16.msra.mxu1 %v3640_v51 }
 0x4fe   : > { %1830 = vmatprep.subr.bf16.mxu0 %v3641_v52  ;;  %1871 = vmatprep.subr.bf16.mxu1 %v3642_v53 }
 0x501   : > { %1831 = vmatpush1.bf16.msra.mxu0 %v3643_v54  ;;  %1872 = vmatpush1.bf16.msra.mxu1 %v3644_v55 }
 0x502   : > { %1832 = vmatprep.subr.bf16.mxu0 %v3645_v61  ;;  %1873 = vmatprep.subr.bf16.mxu1 %v3646_v62 }
 0x505   : > { %1833 = vmatpush1.bf16.msra.mxu0 %v3647_v63  ;;  %1874 = vmatpush1.bf16.msra.mxu1 %v3648_v0 }
 0x506   : > { %1834 = vmatprep.subr.bf16.mxu0 %v3649_v3  ;;  %1875 = vmatprep.subr.bf16.mxu1 %v3650_v15 }
 0x509   : > { %1835 = vmatpush1.bf16.msra.mxu0 %v3651_v59  ;;  %1876 = vmatpush1.bf16.msra.mxu1 %v3652_v9 }
 0x50a   : > { %1836 = vmatprep.subr.bf16.mxu0 %v3653_v14  ;;  %1877 = vmatprep.subr.bf16.mxu1 %v3654_v12 }
 0x50d   : > { %1837 = vmatpush1.bf16.msra.mxu0 %v3655_v36  ;;  %1878 = vmatpush1.bf16.msra.mxu1 %v3656_v4 }
 0x50e   : > { %1838 = vmatprep.subr.bf16.mxu0 %v3657_v6  ;;  %1879 = vmatprep.subr.bf16.mxu1 %v3658_v11 }
 0x511   : > { %1839 = vmatpush1.bf16.msra.mxu0 %v3659_v2  ;;  %1880 = vmatpush1.bf16.msra.mxu1 %v3660_v8 }
 0x512   : > { %1840 = vmatprep.subr.bf16.mxu0 %v3661_v5  ;;  %1881 = vmatprep.subr.bf16.mxu1 %v3662_v10 }
 0x515   : > { %1841 = vmatpush1.bf16.msra.mxu0 %v3663_v57  ;;  %1882 = vmatpush1.bf16.msra.mxu1 %v3664_v49 }
 0x516   : > { %1842 = vmatprep.subr.bf16.mxu0 %v3665_v13  ;;  %1883 = vmatprep.subr.bf16.mxu1 %v3666_v56 }
 0x519   : > { %1843 = vmatpush1.bf16.msra.mxu0 %v3667_v58  ;;  %1884 = vmatpush1.bf16.msra.mxu1 %v3668_v60 }
 0x51a   : > { %1844 = vmatprep.subr.bf16.mxu0 %v3669_v17  ;;  %1885 = vmatprep.subr.bf16.mxu1 %v3670_v31 }
 0x51d   : > { %1845 = vmatpush1.bf16.msra.mxu0 %v3671_v16  ;;  %1886 = vmatpush1.bf16.msra.mxu1 %v3672_v18 }
 0x5b3   : > { %v1732_v21 = vpop.f32.mrb[4].mxu0  ;;  %v1773_v22 = vpop.f32.mrb[4].mxu1 }
 0x5b4   : > { %v2194_v23 = vadd.f32 %v2193_v19, %v1732_v21  ;;  %v1734_v24 = vpop.f32.mrb[5].mxu0  ;;  %v1775_v25 = vpop.f32.mrb[5].mxu1  ;;  %v2200_v35 = vadd.f32 %v2199_v34, %v1773_v22 }
 0x5b5   : > { %v2197_v26 = vadd.f32 %v2196_v20, %v1734_v24  ;;  %v1736_v27 = vpop.f32.mrb[6].mxu0  ;;  %v1777_v28 = vpop.f32.mrb[6].mxu1  ;;  %v2203_v41 = vadd.f32 %v2202_v38, %v1775_v25 }
 0x5b6   : > { %v2173_v29 = vmul.f32 -1.442695, %v2194_v23  ;;  %v1737_v30 = vpop.f32.mrb[7].mxu0  ;;  %v1778_v32 = vpop.f32.mrb[7].mxu1  ;;  %v2175_v40 = vmul.f32 -1.442695, %v2200_v35 }
 0x5b7   : > { %v2174_v33 = vmul.f32 -1.442695, %v2197_v26 }
 0x5b8   : > { %2470 = vpow2.f32 %v2173_v29 }
 0x5b9   : > { %2472 = vpow2.f32 %v2174_v33 }
 0x5ba   : > { %2474 = vpow2.f32 %v2175_v40 }
 0x5bb   : > { %2476 = vtanh.f32 %v2203_v41 }
 0x5c2   : > { %v2471_v42 = vpop.eup %2470 }
 0x5c3   : > { %v2473_v44 = vpop.eup %2472  ;;  %v1789_v45 = vadd.f32 1.0, %v2471_v42 }
 0x5c4   : > { %v1790_v46 = vadd.f32 1.0, %v2473_v44  ;;  %v2475_v47 = vpop.eup %2474 }
 0x5c5   : > { %2478 = vrcp.f32 %v1789_v45  ;;  %v2477_v50 = vpop.eup %2476  ;;  %v1791_v52 = vadd.f32 1.0, %v2475_v47 }
 0x5c6   : > { %2480 = vrcp.f32 %v1790_v46 }
 0x5c7   : > { %2482 = vrcp.f32 %v1791_v52 }
 0x5cf   : > { %v2479_v51 = vpop.eup %2478 }
 0x5d0   : > { %v2481_v53 = vpop.eup %2480  ;;  %v1800_v54 = vmul.f32 %v2479_v51, %v2477_v50 }
 0x5d1   : > { %v1799_v55 = vmul.f32 %v2481_v53, %v3252_v1  ;;  %v2483_v62 = vpop.eup %2482 }
 0x5d3   : > { %v1801_v61 = vadd.f32 %v1800_v54, %v1799_v55 }
 0x5d5   : > { %2484 = vtanh.f32 %v1801_v61  ;;  %1932 = vst [vmem:[%s3414_s10] sm:$0xff] (!%p2182_p12), %v1801_v61 }
 0x5df   : > { %v2485_v63 = vpop.eup %2484 }
 0x5e0   : > { %v1803_v0 = vmul.f32 %v2485_v63, %v2483_v62 }
 0x5e2   : > { %v1804_v3 = vpack.c.bf16 %v1803_v0, %v1803_v0  ;;  %1929 = vst [vmem:[%s3413_s9] sm:$0xff] (!%p2182_p12), %v1803_v0 }
 0x5e4   : > { %1805 = vst [vmem:[#allocation4] sm:$0xf] %v1804_v3 }
 0x5eb   : > { %v1806_v15 = vld [vmem:[#allocation4] sm:$0xff] }
 0x5ec   : > { %v2177_v59 = vcombine.high %v1806_v15, %v1806_v15  ;;  %v2176_v9 = vcombine.low %v1806_v15, %v1806_v15 }
 0x5ee   : > { %1846 = vmatprep.mubr.bf16.mxu0 %v2177_v59  ;;  %1887 = vmatprep.mubr.bf16.mxu1 %v2177_v59 }
 0x5ef   : > { %1847 = vmatmul.mubr.bf16.vlgmr.msra.gmra.mrb[24].mxu0 %v2176_v9  ;;  %1888 = vmatmul.mubr.bf16.vlgmr.msra.gmra.mrb[24].mxu1 %v2176_v9 }
 0x6c2   : > { %v1848_v14 = vpop.f32.mrb[24].mxu0  ;;  %v1889_v12 = vpop.f32.mrb[24].mxu1 }
 0x6c3   : > { %v1849_v1 = vadd.f32 %v1848_v14, %v3116_v37  ;;  %v1850_v36 = vpop.f32.mrb[25].mxu0  ;;  %v1891_v4 = vpop.f32.mrb[25].mxu1  ;;  %v1890_v49 = vadd.f32 %v1889_v12, %v3126_v39 }
 0x6c4   : > { %v1851_v6 = vadd.f32 %v1850_v36, %v3120_v7  ;;  %v1852_v11 = vpop.f32.mrb[26].mxu0  ;;  %v1893_v2 = vpop.f32.mrb[26].mxu1  ;;  %v1892_v13 = vadd.f32 %v1891_v4, %v3130_v48 }
 0x6c5   : > { %v2178_v8 = vmul.f32 -1.442695, %v1849_v1  ;;  %v1853_v5 = vpop.f32.mrb[27].mxu0  ;;  %v1894_v10 = vpop.f32.mrb[27].mxu1  ;;  %v2180_v56 = vmul.f32 -1.442695, %v1890_v49 }
 0x6c6   : > { %v2179_v57 = vmul.f32 -1.442695, %v1851_v6 }
 0x6c7   : > { %2486 = vpow2.f32 %v2178_v8 }
 0x6c8   : > { %2488 = vpow2.f32 %v2179_v57 }
 0x6c9   : > { %2490 = vtanh.f32 %v1892_v13 }
 0x6ca   : > { %2492 = vpow2.f32 %v2180_v56 }
 0x6d1   : > { %v2487_v58 = vpop.eup %2486 }
 0x6d2   : > { %v1905_v60 = vadd.f32 1.0, %v2487_v58  ;;  %v2489_v37 = vpop.eup %2488 }
 0x6d3   : > { %v1906_v7 = vadd.f32 1.0, %v2489_v37  ;;  %v2491_v17 = vpop.eup %2490 }
 0x6d4   : > { %2494 = vrcp.f32 %v1905_v60  ;;  %v2493_v31 = vpop.eup %2492 }
 0x6d5   : > { %2496 = vrcp.f32 %v1906_v7  ;;  %v1907_v20 = vadd.f32 1.0, %v2493_v31 }
 0x6d7   : > { %2498 = vrcp.f32 %v1907_v20 }
 0x6de   : > { %v2495_v16 = vpop.eup %2494 }
 0x6df   : > { %v1916_v18 = vmul.f32 %v2495_v16, %v2491_v17  ;;  %v2497_v19 = vpop.eup %2496 }
 0x6e0   : > { %v1915_v39 = vmul.f32 %v2497_v19, %v3261_v43 }
 0x6e1   : > { %v2499_v48 = vpop.eup %2498 }
 0x6e2   : > { %v1917_v21 = vadd.f32 %v1916_v18, %v1915_v39 }
 0x6e4   : > { %2500 = vtanh.f32 %v1917_v21  ;;  %2184 = vst [vmem:[%s3414_s10 + $0x8] sm:$0xff] (!%p2182_p12), %v1917_v21 }
 0x6ed   : > { %1928 = sbr.rel (%p2182_p12) target bundleno = 1780 (0x6f4), region = 76 }
 0x6ee   : > { %v2501_v22 = vpop.eup %2500 }
 0x6ef   : > { %v1919_v23 = vmul.f32 %v2501_v22, %v2499_v48 }
 0x6f1   : > { %v1920_v24 = vpack.c.bf16 %v1919_v23, %v1919_v23  ;;  %2181 = vst [vmem:[%s2730_s15 + $0x10] sm:$0xff] %v1919_v23  ;;  %2183 = vst [vmem:[%s3413_s9 + $0x8] sm:$0xff] (!%p2182_p12), %v1919_v23 }
 0x6f3   : > { %1921 = vst [vmem:[#allocation4 + $0x4] sm:$0xf] %v1920_v24 }
 0x6f4 PF: > { %1935 = vst [vmem:[#allocation3] sm:$0xff] %v1801_v61  ;;  %1936 = vst [vmem:[#allocation3 + $0x8] sm:$0xff] %v1917_v21 }
 0x6f5 PF: > { %s23_s13 = sadd.s32 1, %s2572_s13  }
 0x6f6   : > { %p20_p13 = scmp.ge.s32.totalorder %s23_s13, 5  }
 0x6f8   :  { %22 = sbr.rel (!%p20_p13) target bundleno = 2 (0x2), region = 136 }
 0x6ff   :  { %1971 = vsyncpa [#allocation6], 1 }
 0x700   :  { %1973 = vsyncpa [#allocation6 + $0x1], 1 }
 0x701   :  { %1974 = vsyncpa [#allocation8], 1 }

</bundles_post_ra>
